<compile_context>
chip_gen: v7x
topology: tpu7x:2x2x1
jax: 0.10.0
libtpu: 0.0.40
codegen_flags: <defaults>
</compile_context>

<pallas_src>
import functools

import jax
import jax.numpy as jnp
import numpy as np
from jax.experimental import pallas as pl
from jax.experimental.pallas import tpu as pltpu


# ----------------------------- kernel ----------------------------------------


def _layernorm(x, gamma, beta, eps=1e-5):
    mu = jnp.mean(x, axis=-1, keepdims=True)
    xc = x - mu
    var = jnp.mean(xc * xc, axis=-1, keepdims=True)
    return xc * jax.lax.rsqrt(var + eps) * gamma + beta


def fused_encoder_kernel(
    x_ref, pos_ref,
    wqkv_ref, bqkv_ref, wo_ref, vecs_ref,
    wf1_ref, bf1_ref, wf2_ref,
    wout_ref, bout_ref,
    o_ref,
    *, num_layers, num_heads, head_dim, batch_per_block, seq_len,
):
    G, S, Dh, H = batch_per_block, seq_len, head_dim, num_heads
    E = H * Dh
    N = G * S
    bf16 = jnp.bfloat16

    # Fused positional add; flatten (G, S, E) -> (G*S, E) rows for all row-wise math.
    x = (x_ref[...] + pos_ref[...]).reshape(N, E)          # f32

    for l in range(num_layers):                            # fully unrolled layer loop
        vec = vecs_ref[l]                                   # (6, E) f32
        bo, g1, b1, bf2v, g2, b2 = (vec[i:i + 1] for i in range(6))

        # ---- fused QKV projection (one lane-dense matmul; scale folded into Q) ----
        qkv = jnp.dot(x.astype(bf16), wqkv_ref[l],
                      preferred_element_type=jnp.float32) + bqkv_ref[l]   # (N, 3E)
        q_all, k_all, v_all = qkv[:, :E], qkv[:, E:2 * E], qkv[:, 2 * E:]

        # ---- attention: per-(batch, head) tiny matmuls, heads re-assembled by lane concat ----
        batch_slabs = []
        for g in range(G):
            r0 = g * S
            heads = []
            for h in range(H):
                c0 = h * Dh
                q = q_all[r0:r0 + S, c0:c0 + Dh].astype(bf16)
                k = k_all[r0:r0 + S, c0:c0 + Dh].astype(bf16)
                v = v_all[r0:r0 + S, c0:c0 + Dh].astype(bf16)
                s = jax.lax.dot_general(q, k, (((1,), (1,)), ((), ())),
                                        preferred_element_type=jnp.float32)   # (S, S)
                m = jnp.max(s, axis=-1, keepdims=True)
                e = jnp.exp(s - m)
                p = e * pl.reciprocal(jnp.sum(e, axis=-1, keepdims=True), approx=True)
                heads.append(jnp.dot(p.astype(bf16), v,
                                     preferred_element_type=jnp.float32))     # (S, Dh)
            batch_slabs.append(jnp.concatenate(heads, axis=-1))               # (S, E)
        attn_in = (jnp.concatenate(batch_slabs, axis=0)
                   if G > 1 else batch_slabs[0])                              # (N, E)

        # single (E, E) output projection per layer
        attn = jnp.dot(attn_in.astype(bf16), wo_ref[l],
                       preferred_element_type=jnp.float32) + bo

        # residual + LayerNorm1
        x = _layernorm(x + attn, g1, b1)

        # feed-forward (Linear -> ReLU -> Linear) + residual + LayerNorm2
        h1 = jnp.dot(x.astype(bf16), wf1_ref[l],
                     preferred_element_type=jnp.float32) + bf1_ref[l]
        h1 = jnp.maximum(h1, 0.0)
        ff = jnp.dot(h1.astype(bf16), wf2_ref[l],
                     preferred_element_type=jnp.float32) + bf2v
        x = _layernorm(x + ff, g2, b2)

    # output linear (lane-dense store: last dim = 128)
    y = jnp.dot(x.astype(bf16), wout_ref[...],
                preferred_element_type=jnp.float32) + bout_ref[...]
    o_ref[...] = y.reshape(G, S, -1).astype(o_ref.dtype)


# ----------------------------- wrapper ----------------------------------------


def _full_spec(shape):
    n = len(shape)
    return pl.BlockSpec(shape, lambda b: (0,) * n)


def _tensorcores_per_device():
    """Rough heuristic: single-TC chips (v5e / v6e) vs dual-TC (v7x, v4/v5p)."""
    try:
        kind = jax.devices()[0].device_kind.lower()
    except Exception:
        return 1
    if "lite" in kind or "v5e" in kind or "v6" in kind:
        return 1
    return 2


@functools.partial(jax.jit, static_argnames=("num_heads", "batch_per_block"))
def transformer_encoder_forward(x_sbe, pos, kp, num_heads, batch_per_block):
    # x_sbe: (S, B, E) -- PyTorch convention.
    S, B, E = x_sbe.shape
    L = kp["wqkv"].shape[0]
    F = kp["wf1"].shape[-1]
    O = kp["wout"].shape[-1]
    G = batch_per_block
    assert B % G == 0
    Dh = E // num_heads

    # Tiny (B,S,E) transpose kept in the wrapper: (b,s)-major rows give cheap
    # static sublane slices per batch inside the kernel (and the fused pos-add
    # + whole forward stay in one pallas_call either way).
    x = jnp.transpose(x_sbe, (1, 0, 2))                    # (B, S, E)

    kernel = functools.partial(
        fused_encoder_kernel, num_layers=L, num_heads=num_heads,
        head_dim=Dh, batch_per_block=G, seq_len=S)

    y = pl.pallas_call(
        kernel,
        out_shape=jax.ShapeDtypeStruct((B, S, O), jnp.float32),
        grid=(B // G,),
        in_specs=[
            pl.BlockSpec((G, S, E), lambda b: (b, 0, 0)),   # x
            _full_spec((S, E)),                              # pos
            _full_spec((L, E, 3 * E)),                       # fused QKV weight (bf16)
            _full_spec((L, 1, 3 * E)),                       # fused QKV bias   (f32)
            _full_spec((L, E, E)),                           # attn out-proj weight (bf16)
            _full_spec((L, 6, E)),                           # [bo, g1, b1, bf2, g2, b2]
            _full_spec((L, E, F)),                           # ff1 weight (bf16)
            _full_spec((L, 1, F)),                           # ff1 bias
            _full_spec((L, F, E)),                           # ff2 weight (bf16)
            _full_spec((E, O)),                              # output linear weight (bf16)
            _full_spec((1, O)),                              # output linear bias
        ],
        out_specs=pl.BlockSpec((G, S, O), lambda b: (b, 0, 0)),
        compiler_params=pltpu.CompilerParams(dimension_semantics=("parallel",)),
    )(
        x, pos,
        kp["wqkv"], kp["bqkv"], kp["wo"], kp["vecs"],
        kp["wf1"], kp["bf1"], kp["wf2"],
        kp["wout"], kp["bout"],
    )
    # PyTorch permute(1, 2, 0): (S,B,O)->(B,O,S); here (B,S,O)->(B,O,S).
    # Kept outside the kernel so the in-kernel store stays lane-dense (O=128).
    return jnp.transpose(y, (0, 2, 1))


def pack_kernel_params(params, num_heads):
    """Re-layout per-layer weights: fused lane-dense QKV (scale folded into Q),
    bf16 MXU weights, consolidated per-layer vectors."""
    E = params["pos"].shape[-1]
    Dh = E // num_heads
    scale = 1.0 / float(np.sqrt(Dh))

    wqkv, bqkv, wo, vecs, wf1, bf1, wf2 = [], [], [], [], [], [], []
    for lp in params["layers"]:
        w = lp["w_in"]                              # (E, 3E) columns = [q | k | v]
        b = lp["b_in"][0]                           # (3E,)
        w = w.at[:, :E].multiply(scale)             # fold softmax scale into Q
        b = b.at[:E].multiply(scale)
        wqkv.append(w.astype(jnp.bfloat16))
        bqkv.append(b[None, :])                     # (1, 3E) f32
        wo.append(lp["w_out"].astype(jnp.bfloat16))  # (E, E)
        vecs.append(jnp.concatenate(
            [lp["b_out"], lp["ln1_g"], lp["ln1_b"],
             lp["b_ff2"], lp["ln2_g"], lp["ln2_b"]], axis=0))   # (6, E)
        wf1.append(lp["w_ff1"].astype(jnp.bfloat16))
        bf1.append(lp["b_ff1"])
        wf2.append(lp["w_ff2"].astype(jnp.bfloat16))

    return {
        "wqkv": jnp.stack(wqkv), "bqkv": jnp.stack(bqkv),
        "wo": jnp.stack(wo), "vecs": jnp.stack(vecs),
        "wf1": jnp.stack(wf1), "bf1": jnp.stack(bf1), "wf2": jnp.stack(wf2),
        "wout": params["w_outp"].astype(jnp.bfloat16),
        "bout": params["b_outp"],
    }


# ----------------------------- reference (pure JAX) ----------------------------


def ref_forward(x_sbe, params, num_heads, matmul_dtype=None):
    """PyTorch-semantics reference.  With matmul_dtype=bfloat16 it mirrors the
    kernel's MXU precision policy (bf16 operands, f32 accumulation)."""
    def mm(a, b):
        if matmul_dtype is not None:
            a, b = a.astype(matmul_dtype), b.astype(matmul_dtype)
        return jnp.dot(a, b, preferred_element_type=jnp.float32)

    def ein(spec, a, b):
        if matmul_dtype is not None:
            a, b = a.astype(matmul_dtype), b.astype(matmul_dtype)
        return jnp.einsum(spec, a, b, preferred_element_type=jnp.float32)

    x = x_sbe + params["pos"][:, None, :]
    x = jnp.transpose(x, (1, 0, 2))
    B, S, E = x.shape
    Dh = E // num_heads
    for lp in params["layers"]:
        qkv = mm(x, lp["w_in"]) + lp["b_in"][0]
        q, k, v = qkv[..., :E], qkv[..., E:2 * E], qkv[..., 2 * E:]
        split = lambda t: t.reshape(B, S, num_heads, Dh).transpose(0, 2, 1, 3)
        qh, kh, vh = split(q), split(k), split(v)
        scores = ein("bhsd,bhtd->bhst", qh, kh) / np.sqrt(Dh).astype(np.float32)
        p = jax.nn.softmax(scores, axis=-1)
        attn = ein("bhst,bhtd->bhsd", p, vh).transpose(0, 2, 1, 3).reshape(B, S, E)
        attn = mm(attn, lp["w_out"]) + lp["b_out"][0]
        x = _layernorm(x + attn, lp["ln1_g"][0], lp["ln1_b"][0])
        ff = mm(jnp.maximum(mm(x, lp["w_ff1"]) + lp["b_ff1"][0], 0.0),
                lp["w_ff2"]) + lp["b_ff2"][0]
        x = _layernorm(x + ff, lp["ln2_g"][0], lp["ln2_b"][0])
    y = mm(x, params["w_outp"]) + params["b_outp"][0]
    return jnp.transpose(y, (0, 2, 1))


# ----------------------------- params & main -----------------------------------


def init_params(key, num_patches, embed_dim, ff_dim, num_layers, out_dim=128):
    def nrm(k, shape, scale=0.05):
        return (scale * jax.random.normal(k, shape)).astype(jnp.float32)

    keys = jax.random.split(key, 2 + num_layers)
    params = {
        "pos": nrm(keys[0], (num_patches, embed_dim)),
        "w_outp": nrm(keys[1], (embed_dim, out_dim)),
        "b_outp": nrm(jax.random.fold_in(keys[1], 1), (1, out_dim)),
        "layers": [],
    }
    for li in range(num_layers):
        lk = jax.random.split(keys[2 + li], 8)
        params["layers"].append({
            "w_in": nrm(lk[0], (embed_dim, 3 * embed_dim)),
            "b_in": nrm(lk[1], (1, 3 * embed_dim)),
            "w_out": nrm(lk[2], (embed_dim, embed_dim)),
            "b_out": nrm(lk[3], (1, embed_dim)),
            "ln1_g": jnp.ones((1, embed_dim), jnp.float32),
            "ln1_b": jnp.zeros((1, embed_dim), jnp.float32),
            "w_ff1": nrm(lk[4], (embed_dim, ff_dim)),
            "b_ff1": nrm(lk[5], (1, ff_dim)),
            "w_ff2": nrm(lk[6], (ff_dim, embed_dim)),
            "b_ff2": nrm(lk[7], (1, embed_dim)),
            "ln2_g": jnp.ones((1, embed_dim), jnp.float32),
            "ln2_b": jnp.zeros((1, embed_dim), jnp.float32),
        })
    return params


if __name__ == "__main__":
    # Small config consistent with the module's forward.
    NUM_PATCHES, BATCH, EMBED_DIM = 8, 2, 32
    NUM_HEADS, FF_DIM, NUM_LAYERS = 4, 64, 2

    key = jax.random.PRNGKey(0)
    kx, kp_ = jax.random.split(key)
    x = jax.random.normal(kx, (NUM_PATCHES, BATCH, EMBED_DIM), jnp.float32)
    params = init_params(kp_, NUM_PATCHES, EMBED_DIM, FF_DIM, NUM_LAYERS)
    kernel_params = pack_kernel_params(params, NUM_HEADS)

    # Single-TC chips: stack all batch rows into one grid step.
    # Dual-TC chips: one batch element per grid step, sharded across cores.
    cores = _tensorcores_per_device()
    n_blocks = min(BATCH, max(1, cores))
    if BATCH % n_blocks:
        n_blocks = BATCH
    batch_per_block = BATCH // n_blocks

    out = transformer_encoder_forward(
        x, params["pos"], kernel_params, NUM_HEADS, batch_per_block)
    out = jax.block_until_ready(out)
    assert out.shape == (BATCH, 128, NUM_PATCHES), out.shape

    # Tight structural check against a reference using the same bf16-MXU
    # precision policy (only remaining deltas: approx reciprocal, scale-fold
    # rounding).
    ref_bf16 = jax.block_until_ready(
        ref_forward(x, params, NUM_HEADS, matmul_dtype=jnp.bfloat16))
    np.testing.assert_allclose(np.asarray(out), np.asarray(ref_bf16),
                               rtol=5e-3, atol=5e-3)

    # Looser check against the pure-f32 (PyTorch-semantics) reference; the gap
    # is the documented cost of feeding the MXU bf16 operands.
    ref_f32 = jax.block_until_ready(ref_forward(x, params, NUM_HEADS))
    np.testing.assert_allclose(np.asarray(out), np.asarray(ref_f32),
                               rtol=3e-2, atol=3e-2)

    print("KERNEL_OK")
</pallas_src>

<mosaic_0001>
module attributes {stable_mosaic.version = 11 : i64} {
  func.func @fused_encoder_kernel(%arg0: i32, %arg1: memref<1x8x32xf32, #tpu.memory_space<vmem>>, %arg2: memref<8x32xf32, #tpu.memory_space<vmem>>, %arg3: memref<2x32x96xbf16, #tpu.memory_space<vmem>>, %arg4: memref<2x1x96xf32, #tpu.memory_space<vmem>>, %arg5: memref<2x32x32xbf16, #tpu.memory_space<vmem>>, %arg6: memref<2x6x32xf32, #tpu.memory_space<vmem>>, %arg7: memref<2x32x64xbf16, #tpu.memory_space<vmem>>, %arg8: memref<2x1x64xf32, #tpu.memory_space<vmem>>, %arg9: memref<2x64x32xbf16, #tpu.memory_space<vmem>>, %arg10: memref<32x128xbf16, #tpu.memory_space<vmem>>, %arg11: memref<1x128xf32, #tpu.memory_space<vmem>>, %arg12: memref<1x8x128xf32, #tpu.memory_space<vmem>>) attributes {dimension_semantics = [#tpu.dimension_semantics<parallel>], iteration_bounds = array<i64: 2>, scalar_prefetch = 0 : i64, scratch_operands = 0 : i64, tpu.core_type = #tpu.core_type<tc>, window_params = [{transform_indices = @transform_0, window_bounds = array<i64: 1, 8, 32>}, {pipeline_mode = #tpu.pipeline_mode<synchronous>, transform_indices = @transform_1, window_bounds = array<i64: 8, 32>}, {pipeline_mode = #tpu.pipeline_mode<synchronous>, transform_indices = @transform_2, window_bounds = array<i64: 2, 32, 96>}, {pipeline_mode = #tpu.pipeline_mode<synchronous>, transform_indices = @transform_3, window_bounds = array<i64: 2, 1, 96>}, {pipeline_mode = #tpu.pipeline_mode<synchronous>, transform_indices = @transform_4, window_bounds = array<i64: 2, 32, 32>}, {pipeline_mode = #tpu.pipeline_mode<synchronous>, transform_indices = @transform_5, window_bounds = array<i64: 2, 6, 32>}, {pipeline_mode = #tpu.pipeline_mode<synchronous>, transform_indices = @transform_6, window_bounds = array<i64: 2, 32, 64>}, {pipeline_mode = #tpu.pipeline_mode<synchronous>, transform_indices = @transform_7, window_bounds = array<i64: 2, 1, 64>}, {pipeline_mode = #tpu.pipeline_mode<synchronous>, transform_indices = @transform_8, window_bounds = array<i64: 2, 64, 32>}, {pipeline_mode = #tpu.pipeline_mode<synchronous>, transform_indices = @transform_9, window_bounds = array<i64: 32, 128>}, {pipeline_mode = #tpu.pipeline_mode<synchronous>, transform_indices = @transform_10, window_bounds = array<i64: 1, 128>}, {transform_indices = @transform_11, window_bounds = array<i64: 1, 8, 128>}]} {
    %c0 = arith.constant 0 : index
    %c0_0 = arith.constant 0 : index
    %c0_1 = arith.constant 0 : index
    %0 = vector.load %arg1[%c0, %c0_0, %c0_1] : memref<1x8x32xf32, #tpu.memory_space<vmem>>, vector<1x8x32xf32>
    %c0_2 = arith.constant 0 : index
    %c0_3 = arith.constant 0 : index
    %1 = vector.load %arg2[%c0_2, %c0_3] : memref<8x32xf32, #tpu.memory_space<vmem>>, vector<8x32xf32>
    %2 = vector.shape_cast %1 : vector<8x32xf32> to vector<1x8x32xf32>
    %3 = arith.addf %0, %2 : vector<1x8x32xf32>
    %4 = vector.shape_cast %3 : vector<1x8x32xf32> to vector<8x32xf32>
    %c0_4 = arith.constant 0 : index
    %c0_5 = arith.constant 0 : index
    %c0_6 = arith.constant 0 : index
    %5 = vector.load %arg6[%c0_4, %c0_5, %c0_6] : memref<2x6x32xf32, #tpu.memory_space<vmem>>, vector<1x6x32xf32>
    %6 = vector.shape_cast %5 : vector<1x6x32xf32> to vector<6x32xf32>
    %7 = vector.extract_strided_slice %6 {offsets = [0, 0], sizes = [1, 32], strides = [1, 1]} : vector<6x32xf32> to vector<1x32xf32>
    %8 = vector.extract_strided_slice %6 {offsets = [1, 0], sizes = [1, 32], strides = [1, 1]} : vector<6x32xf32> to vector<1x32xf32>
    %9 = vector.extract_strided_slice %6 {offsets = [2, 0], sizes = [1, 32], strides = [1, 1]} : vector<6x32xf32> to vector<1x32xf32>
    %10 = vector.extract_strided_slice %6 {offsets = [3, 0], sizes = [1, 32], strides = [1, 1]} : vector<6x32xf32> to vector<1x32xf32>
    %11 = vector.extract_strided_slice %6 {offsets = [4, 0], sizes = [1, 32], strides = [1, 1]} : vector<6x32xf32> to vector<1x32xf32>
    %12 = vector.extract_strided_slice %6 {offsets = [5, 0], sizes = [1, 32], strides = [1, 1]} : vector<6x32xf32> to vector<1x32xf32>
    %13 = arith.truncf %4 : vector<8x32xf32> to vector<8x32xbf16>
    %c0_7 = arith.constant 0 : index
    %c0_8 = arith.constant 0 : index
    %c0_9 = arith.constant 0 : index
    %14 = vector.load %arg3[%c0_7, %c0_8, %c0_9] : memref<2x32x96xbf16, #tpu.memory_space<vmem>>, vector<1x32x96xbf16>
    %15 = vector.shape_cast %14 : vector<1x32x96xbf16> to vector<32x96xbf16>
    %cst = arith.constant dense<0.000000e+00> : vector<8x96xf32>
    %16 = tpu.matmul %13, %15, %cst {dimension_numbers = #tpu.dot_dimension_numbers<[1], [0], [0], [1], [0, 0, 1, 1], [], []>} : vector<8x32xbf16>, vector<32x96xbf16>, vector<8x96xf32> -> vector<8x96xf32>
    %c0_10 = arith.constant 0 : index
    %c0_11 = arith.constant 0 : index
    %c0_12 = arith.constant 0 : index
    %17 = vector.load %arg4[%c0_10, %c0_11, %c0_12] : memref<2x1x96xf32, #tpu.memory_space<vmem>>, vector<1x1x96xf32>
    %18 = vector.shape_cast %17 : vector<1x1x96xf32> to vector<1x96xf32>
    %19 = vector.broadcast %18 : vector<1x96xf32> to vector<8x96xf32>
    %20 = arith.addf %16, %19 : vector<8x96xf32>
    %21 = vector.extract_strided_slice %20 {offsets = [0, 0], sizes = [8, 32], strides = [1, 1]} : vector<8x96xf32> to vector<8x32xf32>
    %22 = vector.extract_strided_slice %20 {offsets = [0, 32], sizes = [8, 32], strides = [1, 1]} : vector<8x96xf32> to vector<8x32xf32>
    %23 = vector.extract_strided_slice %20 {offsets = [0, 64], sizes = [8, 32], strides = [1, 1]} : vector<8x96xf32> to vector<8x32xf32>
    %24 = vector.extract_strided_slice %21 {offsets = [0, 0], sizes = [8, 8], strides = [1, 1]} : vector<8x32xf32> to vector<8x8xf32>
    %25 = arith.truncf %24 : vector<8x8xf32> to vector<8x8xbf16>
    %26 = vector.extract_strided_slice %22 {offsets = [0, 0], sizes = [8, 8], strides = [1, 1]} : vector<8x32xf32> to vector<8x8xf32>
    %27 = arith.truncf %26 : vector<8x8xf32> to vector<8x8xbf16>
    %28 = vector.extract_strided_slice %23 {offsets = [0, 0], sizes = [8, 8], strides = [1, 1]} : vector<8x32xf32> to vector<8x8xf32>
    %29 = arith.truncf %28 : vector<8x8xf32> to vector<8x8xbf16>
    %cst_13 = arith.constant dense<0.000000e+00> : vector<8x8xf32>
    %30 = tpu.matmul %25, %27, %cst_13 {dimension_numbers = #tpu.dot_dimension_numbers<[1], [1], [0], [0], [0, 0, 1, 0], [], []>} : vector<8x8xbf16>, vector<8x8xbf16>, vector<8x8xf32> -> vector<8x8xf32>
    %cst_14 = arith.constant dense<0xFF800000> : vector<8xf32>
    %31 = vector.multi_reduction <maximumf>, %30, %cst_14 [1] : vector<8x8xf32> to vector<8xf32>
    %32 = vector.shape_cast %31 : vector<8xf32> to vector<8x1xf32>
    %33 = vector.broadcast %32 : vector<8x1xf32> to vector<8x8xf32>
    %34 = arith.subf %30, %33 : vector<8x8xf32>
    %35 = math.exp %34 : vector<8x8xf32>
    %cst_15 = arith.constant dense<0.000000e+00> : vector<8xf32>
    %36 = vector.multi_reduction <add>, %35, %cst_15 [1] : vector<8x8xf32> to vector<8xf32>
    %37 = vector.shape_cast %36 : vector<8xf32> to vector<8x1xf32>
    %38 = tpu.reciprocal %37 {approx = true} : vector<8x1xf32> -> vector<8x1xf32>
    %39 = vector.broadcast %38 : vector<8x1xf32> to vector<8x8xf32>
    %40 = arith.mulf %35, %39 : vector<8x8xf32>
    %41 = arith.truncf %40 : vector<8x8xf32> to vector<8x8xbf16>
    %cst_16 = arith.constant dense<0.000000e+00> : vector<8x8xf32>
    %42 = tpu.matmul %41, %29, %cst_16 {dimension_numbers = #tpu.dot_dimension_numbers<[1], [0], [0], [1], [0, 0, 1, 1], [], []>} : vector<8x8xbf16>, vector<8x8xbf16>, vector<8x8xf32> -> vector<8x8xf32>
    %43 = vector.extract_strided_slice %21 {offsets = [0, 8], sizes = [8, 8], strides = [1, 1]} : vector<8x32xf32> to vector<8x8xf32>
    %44 = arith.truncf %43 : vector<8x8xf32> to vector<8x8xbf16>
    %45 = vector.extract_strided_slice %22 {offsets = [0, 8], sizes = [8, 8], strides = [1, 1]} : vector<8x32xf32> to vector<8x8xf32>
    %46 = arith.truncf %45 : vector<8x8xf32> to vector<8x8xbf16>
    %47 = vector.extract_strided_slice %23 {offsets = [0, 8], sizes = [8, 8], strides = [1, 1]} : vector<8x32xf32> to vector<8x8xf32>
    %48 = arith.truncf %47 : vector<8x8xf32> to vector<8x8xbf16>
    %cst_17 = arith.constant dense<0.000000e+00> : vector<8x8xf32>
    %49 = tpu.matmul %44, %46, %cst_17 {dimension_numbers = #tpu.dot_dimension_numbers<[1], [1], [0], [0], [0, 0, 1, 0], [], []>} : vector<8x8xbf16>, vector<8x8xbf16>, vector<8x8xf32> -> vector<8x8xf32>
    %cst_18 = arith.constant dense<0xFF800000> : vector<8xf32>
    %50 = vector.multi_reduction <maximumf>, %49, %cst_18 [1] : vector<8x8xf32> to vector<8xf32>
    %51 = vector.shape_cast %50 : vector<8xf32> to vector<8x1xf32>
    %52 = vector.broadcast %51 : vector<8x1xf32> to vector<8x8xf32>
    %53 = arith.subf %49, %52 : vector<8x8xf32>
    %54 = math.exp %53 : vector<8x8xf32>
    %cst_19 = arith.constant dense<0.000000e+00> : vector<8xf32>
    %55 = vector.multi_reduction <add>, %54, %cst_19 [1] : vector<8x8xf32> to vector<8xf32>
    %56 = vector.shape_cast %55 : vector<8xf32> to vector<8x1xf32>
    %57 = tpu.reciprocal %56 {approx = true} : vector<8x1xf32> -> vector<8x1xf32>
    %58 = vector.broadcast %57 : vector<8x1xf32> to vector<8x8xf32>
    %59 = arith.mulf %54, %58 : vector<8x8xf32>
    %60 = arith.truncf %59 : vector<8x8xf32> to vector<8x8xbf16>
    %cst_20 = arith.constant dense<0.000000e+00> : vector<8x8xf32>
    %61 = tpu.matmul %60, %48, %cst_20 {dimension_numbers = #tpu.dot_dimension_numbers<[1], [0], [0], [1], [0, 0, 1, 1], [], []>} : vector<8x8xbf16>, vector<8x8xbf16>, vector<8x8xf32> -> vector<8x8xf32>
    %62 = vector.extract_strided_slice %21 {offsets = [0, 16], sizes = [8, 8], strides = [1, 1]} : vector<8x32xf32> to vector<8x8xf32>
    %63 = arith.truncf %62 : vector<8x8xf32> to vector<8x8xbf16>
    %64 = vector.extract_strided_slice %22 {offsets = [0, 16], sizes = [8, 8], strides = [1, 1]} : vector<8x32xf32> to vector<8x8xf32>
    %65 = arith.truncf %64 : vector<8x8xf32> to vector<8x8xbf16>
    %66 = vector.extract_strided_slice %23 {offsets = [0, 16], sizes = [8, 8], strides = [1, 1]} : vector<8x32xf32> to vector<8x8xf32>
    %67 = arith.truncf %66 : vector<8x8xf32> to vector<8x8xbf16>
    %cst_21 = arith.constant dense<0.000000e+00> : vector<8x8xf32>
    %68 = tpu.matmul %63, %65, %cst_21 {dimension_numbers = #tpu.dot_dimension_numbers<[1], [1], [0], [0], [0, 0, 1, 0], [], []>} : vector<8x8xbf16>, vector<8x8xbf16>, vector<8x8xf32> -> vector<8x8xf32>
    %cst_22 = arith.constant dense<0xFF800000> : vector<8xf32>
    %69 = vector.multi_reduction <maximumf>, %68, %cst_22 [1] : vector<8x8xf32> to vector<8xf32>
    %70 = vector.shape_cast %69 : vector<8xf32> to vector<8x1xf32>
    %71 = vector.broadcast %70 : vector<8x1xf32> to vector<8x8xf32>
    %72 = arith.subf %68, %71 : vector<8x8xf32>
    %73 = math.exp %72 : vector<8x8xf32>
    %cst_23 = arith.constant dense<0.000000e+00> : vector<8xf32>
    %74 = vector.multi_reduction <add>, %73, %cst_23 [1] : vector<8x8xf32> to vector<8xf32>
    %75 = vector.shape_cast %74 : vector<8xf32> to vector<8x1xf32>
    %76 = tpu.reciprocal %75 {approx = true} : vector<8x1xf32> -> vector<8x1xf32>
    %77 = vector.broadcast %76 : vector<8x1xf32> to vector<8x8xf32>
    %78 = arith.mulf %73, %77 : vector<8x8xf32>
    %79 = arith.truncf %78 : vector<8x8xf32> to vector<8x8xbf16>
    %cst_24 = arith.constant dense<0.000000e+00> : vector<8x8xf32>
    %80 = tpu.matmul %79, %67, %cst_24 {dimension_numbers = #tpu.dot_dimension_numbers<[1], [0], [0], [1], [0, 0, 1, 1], [], []>} : vector<8x8xbf16>, vector<8x8xbf16>, vector<8x8xf32> -> vector<8x8xf32>
    %81 = vector.extract_strided_slice %21 {offsets = [0, 24], sizes = [8, 8], strides = [1, 1]} : vector<8x32xf32> to vector<8x8xf32>
    %82 = arith.truncf %81 : vector<8x8xf32> to vector<8x8xbf16>
    %83 = vector.extract_strided_slice %22 {offsets = [0, 24], sizes = [8, 8], strides = [1, 1]} : vector<8x32xf32> to vector<8x8xf32>
    %84 = arith.truncf %83 : vector<8x8xf32> to vector<8x8xbf16>
    %85 = vector.extract_strided_slice %23 {offsets = [0, 24], sizes = [8, 8], strides = [1, 1]} : vector<8x32xf32> to vector<8x8xf32>
    %86 = arith.truncf %85 : vector<8x8xf32> to vector<8x8xbf16>
    %cst_25 = arith.constant dense<0.000000e+00> : vector<8x8xf32>
    %87 = tpu.matmul %82, %84, %cst_25 {dimension_numbers = #tpu.dot_dimension_numbers<[1], [1], [0], [0], [0, 0, 1, 0], [], []>} : vector<8x8xbf16>, vector<8x8xbf16>, vector<8x8xf32> -> vector<8x8xf32>
    %cst_26 = arith.constant dense<0xFF800000> : vector<8xf32>
    %88 = vector.multi_reduction <maximumf>, %87, %cst_26 [1] : vector<8x8xf32> to vector<8xf32>
    %89 = vector.shape_cast %88 : vector<8xf32> to vector<8x1xf32>
    %90 = vector.broadcast %89 : vector<8x1xf32> to vector<8x8xf32>
    %91 = arith.subf %87, %90 : vector<8x8xf32>
    %92 = math.exp %91 : vector<8x8xf32>
    %cst_27 = arith.constant dense<0.000000e+00> : vector<8xf32>
    %93 = vector.multi_reduction <add>, %92, %cst_27 [1] : vector<8x8xf32> to vector<8xf32>
    %94 = vector.shape_cast %93 : vector<8xf32> to vector<8x1xf32>
    %95 = tpu.reciprocal %94 {approx = true} : vector<8x1xf32> -> vector<8x1xf32>
    %96 = vector.broadcast %95 : vector<8x1xf32> to vector<8x8xf32>
    %97 = arith.mulf %92, %96 : vector<8x8xf32>
    %98 = arith.truncf %97 : vector<8x8xf32> to vector<8x8xbf16>
    %cst_28 = arith.constant dense<0.000000e+00> : vector<8x8xf32>
    %99 = tpu.matmul %98, %86, %cst_28 {dimension_numbers = #tpu.dot_dimension_numbers<[1], [0], [0], [1], [0, 0, 1, 1], [], []>} : vector<8x8xbf16>, vector<8x8xbf16>, vector<8x8xf32> -> vector<8x8xf32>
    %100 = tpu.concatenate %42, %61, %80, %99 in 1 : vector<8x8xf32>, vector<8x8xf32>, vector<8x8xf32>, vector<8x8xf32> -> vector<8x32xf32>
    %101 = arith.truncf %100 : vector<8x32xf32> to vector<8x32xbf16>
    %c0_29 = arith.constant 0 : index
    %c0_30 = arith.constant 0 : index
    %c0_31 = arith.constant 0 : index
    %102 = vector.load %arg5[%c0_29, %c0_30, %c0_31] : memref<2x32x32xbf16, #tpu.memory_space<vmem>>, vector<1x32x32xbf16>
    %103 = vector.shape_cast %102 : vector<1x32x32xbf16> to vector<32x32xbf16>
    %cst_32 = arith.constant dense<0.000000e+00> : vector<8x32xf32>
    %104 = tpu.matmul %101, %103, %cst_32 {dimension_numbers = #tpu.dot_dimension_numbers<[1], [0], [0], [1], [0, 0, 1, 1], [], []>} : vector<8x32xbf16>, vector<32x32xbf16>, vector<8x32xf32> -> vector<8x32xf32>
    %105 = vector.broadcast %7 : vector<1x32xf32> to vector<8x32xf32>
    %106 = arith.addf %104, %105 : vector<8x32xf32>
    %107 = arith.addf %4, %106 : vector<8x32xf32>
    %cst_33 = arith.constant dense<0.000000e+00> : vector<8xf32>
    %108 = vector.multi_reduction <add>, %107, %cst_33 [1] : vector<8x32xf32> to vector<8xf32>
    %109 = vector.shape_cast %108 : vector<8xf32> to vector<8x1xf32>
    %cst_34 = arith.constant 3.200000e+01 : f32
    %110 = vector.broadcast %cst_34 : f32 to vector<8x1xf32>
    %111 = arith.divf %109, %110 : vector<8x1xf32>
    %112 = vector.broadcast %111 : vector<8x1xf32> to vector<8x32xf32>
    %113 = arith.subf %107, %112 : vector<8x32xf32>
    %114 = arith.mulf %113, %113 : vector<8x32xf32>
    %cst_35 = arith.constant dense<0.000000e+00> : vector<8xf32>
    %115 = vector.multi_reduction <add>, %114, %cst_35 [1] : vector<8x32xf32> to vector<8xf32>
    %116 = vector.shape_cast %115 : vector<8xf32> to vector<8x1xf32>
    %cst_36 = arith.constant 3.200000e+01 : f32
    %117 = vector.broadcast %cst_36 : f32 to vector<8x1xf32>
    %118 = arith.divf %116, %117 : vector<8x1xf32>
    %cst_37 = arith.constant 9.99999974E-6 : f32
    %119 = vector.broadcast %cst_37 : f32 to vector<8x1xf32>
    %120 = arith.addf %118, %119 : vector<8x1xf32>
    %121 = math.rsqrt %120 : vector<8x1xf32>
    %122 = vector.broadcast %121 : vector<8x1xf32> to vector<8x32xf32>
    %123 = arith.mulf %113, %122 : vector<8x32xf32>
    %124 = vector.broadcast %8 : vector<1x32xf32> to vector<8x32xf32>
    %125 = arith.mulf %123, %124 : vector<8x32xf32>
    %126 = vector.broadcast %9 : vector<1x32xf32> to vector<8x32xf32>
    %127 = arith.addf %125, %126 : vector<8x32xf32>
    %128 = arith.truncf %127 : vector<8x32xf32> to vector<8x32xbf16>
    %c0_38 = arith.constant 0 : index
    %c0_39 = arith.constant 0 : index
    %c0_40 = arith.constant 0 : index
    %129 = vector.load %arg7[%c0_38, %c0_39, %c0_40] : memref<2x32x64xbf16, #tpu.memory_space<vmem>>, vector<1x32x64xbf16>
    %130 = vector.shape_cast %129 : vector<1x32x64xbf16> to vector<32x64xbf16>
    %cst_41 = arith.constant dense<0.000000e+00> : vector<8x64xf32>
    %131 = tpu.matmul %128, %130, %cst_41 {dimension_numbers = #tpu.dot_dimension_numbers<[1], [0], [0], [1], [0, 0, 1, 1], [], []>} : vector<8x32xbf16>, vector<32x64xbf16>, vector<8x64xf32> -> vector<8x64xf32>
    %c0_42 = arith.constant 0 : index
    %c0_43 = arith.constant 0 : index
    %c0_44 = arith.constant 0 : index
    %132 = vector.load %arg8[%c0_42, %c0_43, %c0_44] : memref<2x1x64xf32, #tpu.memory_space<vmem>>, vector<1x1x64xf32>
    %133 = vector.shape_cast %132 : vector<1x1x64xf32> to vector<1x64xf32>
    %134 = vector.broadcast %133 : vector<1x64xf32> to vector<8x64xf32>
    %135 = arith.addf %131, %134 : vector<8x64xf32>
    %cst_45 = arith.constant 0.000000e+00 : f32
    %136 = vector.broadcast %cst_45 : f32 to vector<8x64xf32>
    %137 = arith.maximumf %135, %136 : vector<8x64xf32>
    %138 = arith.truncf %137 : vector<8x64xf32> to vector<8x64xbf16>
    %c0_46 = arith.constant 0 : index
    %c0_47 = arith.constant 0 : index
    %c0_48 = arith.constant 0 : index
    %139 = vector.load %arg9[%c0_46, %c0_47, %c0_48] : memref<2x64x32xbf16, #tpu.memory_space<vmem>>, vector<1x64x32xbf16>
    %140 = vector.shape_cast %139 : vector<1x64x32xbf16> to vector<64x32xbf16>
    %cst_49 = arith.constant dense<0.000000e+00> : vector<8x32xf32>
    %141 = tpu.matmul %138, %140, %cst_49 {dimension_numbers = #tpu.dot_dimension_numbers<[1], [0], [0], [1], [0, 0, 1, 1], [], []>} : vector<8x64xbf16>, vector<64x32xbf16>, vector<8x32xf32> -> vector<8x32xf32>
    %142 = vector.broadcast %10 : vector<1x32xf32> to vector<8x32xf32>
    %143 = arith.addf %141, %142 : vector<8x32xf32>
    %144 = arith.addf %127, %143 : vector<8x32xf32>
    %cst_50 = arith.constant dense<0.000000e+00> : vector<8xf32>
    %145 = vector.multi_reduction <add>, %144, %cst_50 [1] : vector<8x32xf32> to vector<8xf32>
    %146 = vector.shape_cast %145 : vector<8xf32> to vector<8x1xf32>
    %cst_51 = arith.constant 3.200000e+01 : f32
    %147 = vector.broadcast %cst_51 : f32 to vector<8x1xf32>
    %148 = arith.divf %146, %147 : vector<8x1xf32>
    %149 = vector.broadcast %148 : vector<8x1xf32> to vector<8x32xf32>
    %150 = arith.subf %144, %149 : vector<8x32xf32>
    %151 = arith.mulf %150, %150 : vector<8x32xf32>
    %cst_52 = arith.constant dense<0.000000e+00> : vector<8xf32>
    %152 = vector.multi_reduction <add>, %151, %cst_52 [1] : vector<8x32xf32> to vector<8xf32>
    %153 = vector.shape_cast %152 : vector<8xf32> to vector<8x1xf32>
    %cst_53 = arith.constant 3.200000e+01 : f32
    %154 = vector.broadcast %cst_53 : f32 to vector<8x1xf32>
    %155 = arith.divf %153, %154 : vector<8x1xf32>
    %cst_54 = arith.constant 9.99999974E-6 : f32
    %156 = vector.broadcast %cst_54 : f32 to vector<8x1xf32>
    %157 = arith.addf %155, %156 : vector<8x1xf32>
    %158 = math.rsqrt %157 : vector<8x1xf32>
    %159 = vector.broadcast %158 : vector<8x1xf32> to vector<8x32xf32>
    %160 = arith.mulf %150, %159 : vector<8x32xf32>
    %161 = vector.broadcast %11 : vector<1x32xf32> to vector<8x32xf32>
    %162 = arith.mulf %160, %161 : vector<8x32xf32>
    %163 = vector.broadcast %12 : vector<1x32xf32> to vector<8x32xf32>
    %164 = arith.addf %162, %163 : vector<8x32xf32>
    %c1 = arith.constant 1 : index
    %c0_55 = arith.constant 0 : index
    %c0_56 = arith.constant 0 : index
    %165 = vector.load %arg6[%c1, %c0_55, %c0_56] : memref<2x6x32xf32, #tpu.memory_space<vmem>>, vector<1x6x32xf32>
    %166 = vector.shape_cast %165 : vector<1x6x32xf32> to vector<6x32xf32>
    %167 = vector.extract_strided_slice %166 {offsets = [0, 0], sizes = [1, 32], strides = [1, 1]} : vector<6x32xf32> to vector<1x32xf32>
    %168 = vector.extract_strided_slice %166 {offsets = [1, 0], sizes = [1, 32], strides = [1, 1]} : vector<6x32xf32> to vector<1x32xf32>
    %169 = vector.extract_strided_slice %166 {offsets = [2, 0], sizes = [1, 32], strides = [1, 1]} : vector<6x32xf32> to vector<1x32xf32>
    %170 = vector.extract_strided_slice %166 {offsets = [3, 0], sizes = [1, 32], strides = [1, 1]} : vector<6x32xf32> to vector<1x32xf32>
    %171 = vector.extract_strided_slice %166 {offsets = [4, 0], sizes = [1, 32], strides = [1, 1]} : vector<6x32xf32> to vector<1x32xf32>
    %172 = vector.extract_strided_slice %166 {offsets = [5, 0], sizes = [1, 32], strides = [1, 1]} : vector<6x32xf32> to vector<1x32xf32>
    %173 = arith.truncf %164 : vector<8x32xf32> to vector<8x32xbf16>
    %c1_57 = arith.constant 1 : index
    %c0_58 = arith.constant 0 : index
    %c0_59 = arith.constant 0 : index
    %174 = vector.load %arg3[%c1_57, %c0_58, %c0_59] : memref<2x32x96xbf16, #tpu.memory_space<vmem>>, vector<1x32x96xbf16>
    %175 = vector.shape_cast %174 : vector<1x32x96xbf16> to vector<32x96xbf16>
    %cst_60 = arith.constant dense<0.000000e+00> : vector<8x96xf32>
    %176 = tpu.matmul %173, %175, %cst_60 {dimension_numbers = #tpu.dot_dimension_numbers<[1], [0], [0], [1], [0, 0, 1, 1], [], []>} : vector<8x32xbf16>, vector<32x96xbf16>, vector<8x96xf32> -> vector<8x96xf32>
    %c1_61 = arith.constant 1 : index
    %c0_62 = arith.constant 0 : index
    %c0_63 = arith.constant 0 : index
    %177 = vector.load %arg4[%c1_61, %c0_62, %c0_63] : memref<2x1x96xf32, #tpu.memory_space<vmem>>, vector<1x1x96xf32>
    %178 = vector.shape_cast %177 : vector<1x1x96xf32> to vector<1x96xf32>
    %179 = vector.broadcast %178 : vector<1x96xf32> to vector<8x96xf32>
    %180 = arith.addf %176, %179 : vector<8x96xf32>
    %181 = vector.extract_strided_slice %180 {offsets = [0, 0], sizes = [8, 32], strides = [1, 1]} : vector<8x96xf32> to vector<8x32xf32>
    %182 = vector.extract_strided_slice %180 {offsets = [0, 32], sizes = [8, 32], strides = [1, 1]} : vector<8x96xf32> to vector<8x32xf32>
    %183 = vector.extract_strided_slice %180 {offsets = [0, 64], sizes = [8, 32], strides = [1, 1]} : vector<8x96xf32> to vector<8x32xf32>
    %184 = vector.extract_strided_slice %181 {offsets = [0, 0], sizes = [8, 8], strides = [1, 1]} : vector<8x32xf32> to vector<8x8xf32>
    %185 = arith.truncf %184 : vector<8x8xf32> to vector<8x8xbf16>
    %186 = vector.extract_strided_slice %182 {offsets = [0, 0], sizes = [8, 8], strides = [1, 1]} : vector<8x32xf32> to vector<8x8xf32>
    %187 = arith.truncf %186 : vector<8x8xf32> to vector<8x8xbf16>
    %188 = vector.extract_strided_slice %183 {offsets = [0, 0], sizes = [8, 8], strides = [1, 1]} : vector<8x32xf32> to vector<8x8xf32>
    %189 = arith.truncf %188 : vector<8x8xf32> to vector<8x8xbf16>
    %cst_64 = arith.constant dense<0.000000e+00> : vector<8x8xf32>
    %190 = tpu.matmul %185, %187, %cst_64 {dimension_numbers = #tpu.dot_dimension_numbers<[1], [1], [0], [0], [0, 0, 1, 0], [], []>} : vector<8x8xbf16>, vector<8x8xbf16>, vector<8x8xf32> -> vector<8x8xf32>
    %cst_65 = arith.constant dense<0xFF800000> : vector<8xf32>
    %191 = vector.multi_reduction <maximumf>, %190, %cst_65 [1] : vector<8x8xf32> to vector<8xf32>
    %192 = vector.shape_cast %191 : vector<8xf32> to vector<8x1xf32>
    %193 = vector.broadcast %192 : vector<8x1xf32> to vector<8x8xf32>
    %194 = arith.subf %190, %193 : vector<8x8xf32>
    %195 = math.exp %194 : vector<8x8xf32>
    %cst_66 = arith.constant dense<0.000000e+00> : vector<8xf32>
    %196 = vector.multi_reduction <add>, %195, %cst_66 [1] : vector<8x8xf32> to vector<8xf32>
    %197 = vector.shape_cast %196 : vector<8xf32> to vector<8x1xf32>
    %198 = tpu.reciprocal %197 {approx = true} : vector<8x1xf32> -> vector<8x1xf32>
    %199 = vector.broadcast %198 : vector<8x1xf32> to vector<8x8xf32>
    %200 = arith.mulf %195, %199 : vector<8x8xf32>
    %201 = arith.truncf %200 : vector<8x8xf32> to vector<8x8xbf16>
    %cst_67 = arith.constant dense<0.000000e+00> : vector<8x8xf32>
    %202 = tpu.matmul %201, %189, %cst_67 {dimension_numbers = #tpu.dot_dimension_numbers<[1], [0], [0], [1], [0, 0, 1, 1], [], []>} : vector<8x8xbf16>, vector<8x8xbf16>, vector<8x8xf32> -> vector<8x8xf32>
    %203 = vector.extract_strided_slice %181 {offsets = [0, 8], sizes = [8, 8], strides = [1, 1]} : vector<8x32xf32> to vector<8x8xf32>
    %204 = arith.truncf %203 : vector<8x8xf32> to vector<8x8xbf16>
    %205 = vector.extract_strided_slice %182 {offsets = [0, 8], sizes = [8, 8], strides = [1, 1]} : vector<8x32xf32> to vector<8x8xf32>
    %206 = arith.truncf %205 : vector<8x8xf32> to vector<8x8xbf16>
    %207 = vector.extract_strided_slice %183 {offsets = [0, 8], sizes = [8, 8], strides = [1, 1]} : vector<8x32xf32> to vector<8x8xf32>
    %208 = arith.truncf %207 : vector<8x8xf32> to vector<8x8xbf16>
    %cst_68 = arith.constant dense<0.000000e+00> : vector<8x8xf32>
    %209 = tpu.matmul %204, %206, %cst_68 {dimension_numbers = #tpu.dot_dimension_numbers<[1], [1], [0], [0], [0, 0, 1, 0], [], []>} : vector<8x8xbf16>, vector<8x8xbf16>, vector<8x8xf32> -> vector<8x8xf32>
    %cst_69 = arith.constant dense<0xFF800000> : vector<8xf32>
    %210 = vector.multi_reduction <maximumf>, %209, %cst_69 [1] : vector<8x8xf32> to vector<8xf32>
    %211 = vector.shape_cast %210 : vector<8xf32> to vector<8x1xf32>
    %212 = vector.broadcast %211 : vector<8x1xf32> to vector<8x8xf32>
    %213 = arith.subf %209, %212 : vector<8x8xf32>
    %214 = math.exp %213 : vector<8x8xf32>
    %cst_70 = arith.constant dense<0.000000e+00> : vector<8xf32>
    %215 = vector.multi_reduction <add>, %214, %cst_70 [1] : vector<8x8xf32> to vector<8xf32>
    %216 = vector.shape_cast %215 : vector<8xf32> to vector<8x1xf32>
    %217 = tpu.reciprocal %216 {approx = true} : vector<8x1xf32> -> vector<8x1xf32>
    %218 = vector.broadcast %217 : vector<8x1xf32> to vector<8x8xf32>
    %219 = arith.mulf %214, %218 : vector<8x8xf32>
    %220 = arith.truncf %219 : vector<8x8xf32> to vector<8x8xbf16>
    %cst_71 = arith.constant dense<0.000000e+00> : vector<8x8xf32>
    %221 = tpu.matmul %220, %208, %cst_71 {dimension_numbers = #tpu.dot_dimension_numbers<[1], [0], [0], [1], [0, 0, 1, 1], [], []>} : vector<8x8xbf16>, vector<8x8xbf16>, vector<8x8xf32> -> vector<8x8xf32>
    %222 = vector.extract_strided_slice %181 {offsets = [0, 16], sizes = [8, 8], strides = [1, 1]} : vector<8x32xf32> to vector<8x8xf32>
    %223 = arith.truncf %222 : vector<8x8xf32> to vector<8x8xbf16>
    %224 = vector.extract_strided_slice %182 {offsets = [0, 16], sizes = [8, 8], strides = [1, 1]} : vector<8x32xf32> to vector<8x8xf32>
    %225 = arith.truncf %224 : vector<8x8xf32> to vector<8x8xbf16>
    %226 = vector.extract_strided_slice %183 {offsets = [0, 16], sizes = [8, 8], strides = [1, 1]} : vector<8x32xf32> to vector<8x8xf32>
    %227 = arith.truncf %226 : vector<8x8xf32> to vector<8x8xbf16>
    %cst_72 = arith.constant dense<0.000000e+00> : vector<8x8xf32>
    %228 = tpu.matmul %223, %225, %cst_72 {dimension_numbers = #tpu.dot_dimension_numbers<[1], [1], [0], [0], [0, 0, 1, 0], [], []>} : vector<8x8xbf16>, vector<8x8xbf16>, vector<8x8xf32> -> vector<8x8xf32>
    %cst_73 = arith.constant dense<0xFF800000> : vector<8xf32>
    %229 = vector.multi_reduction <maximumf>, %228, %cst_73 [1] : vector<8x8xf32> to vector<8xf32>
    %230 = vector.shape_cast %229 : vector<8xf32> to vector<8x1xf32>
    %231 = vector.broadcast %230 : vector<8x1xf32> to vector<8x8xf32>
    %232 = arith.subf %228, %231 : vector<8x8xf32>
    %233 = math.exp %232 : vector<8x8xf32>
    %cst_74 = arith.constant dense<0.000000e+00> : vector<8xf32>
    %234 = vector.multi_reduction <add>, %233, %cst_74 [1] : vector<8x8xf32> to vector<8xf32>
    %235 = vector.shape_cast %234 : vector<8xf32> to vector<8x1xf32>
    %236 = tpu.reciprocal %235 {approx = true} : vector<8x1xf32> -> vector<8x1xf32>
    %237 = vector.broadcast %236 : vector<8x1xf32> to vector<8x8xf32>
    %238 = arith.mulf %233, %237 : vector<8x8xf32>
    %239 = arith.truncf %238 : vector<8x8xf32> to vector<8x8xbf16>
    %cst_75 = arith.constant dense<0.000000e+00> : vector<8x8xf32>
    %240 = tpu.matmul %239, %227, %cst_75 {dimension_numbers = #tpu.dot_dimension_numbers<[1], [0], [0], [1], [0, 0, 1, 1], [], []>} : vector<8x8xbf16>, vector<8x8xbf16>, vector<8x8xf32> -> vector<8x8xf32>
    %241 = vector.extract_strided_slice %181 {offsets = [0, 24], sizes = [8, 8], strides = [1, 1]} : vector<8x32xf32> to vector<8x8xf32>
    %242 = arith.truncf %241 : vector<8x8xf32> to vector<8x8xbf16>
    %243 = vector.extract_strided_slice %182 {offsets = [0, 24], sizes = [8, 8], strides = [1, 1]} : vector<8x32xf32> to vector<8x8xf32>
    %244 = arith.truncf %243 : vector<8x8xf32> to vector<8x8xbf16>
    %245 = vector.extract_strided_slice %183 {offsets = [0, 24], sizes = [8, 8], strides = [1, 1]} : vector<8x32xf32> to vector<8x8xf32>
    %246 = arith.truncf %245 : vector<8x8xf32> to vector<8x8xbf16>
    %cst_76 = arith.constant dense<0.000000e+00> : vector<8x8xf32>
    %247 = tpu.matmul %242, %244, %cst_76 {dimension_numbers = #tpu.dot_dimension_numbers<[1], [1], [0], [0], [0, 0, 1, 0], [], []>} : vector<8x8xbf16>, vector<8x8xbf16>, vector<8x8xf32> -> vector<8x8xf32>
    %cst_77 = arith.constant dense<0xFF800000> : vector<8xf32>
    %248 = vector.multi_reduction <maximumf>, %247, %cst_77 [1] : vector<8x8xf32> to vector<8xf32>
    %249 = vector.shape_cast %248 : vector<8xf32> to vector<8x1xf32>
    %250 = vector.broadcast %249 : vector<8x1xf32> to vector<8x8xf32>
    %251 = arith.subf %247, %250 : vector<8x8xf32>
    %252 = math.exp %251 : vector<8x8xf32>
    %cst_78 = arith.constant dense<0.000000e+00> : vector<8xf32>
    %253 = vector.multi_reduction <add>, %252, %cst_78 [1] : vector<8x8xf32> to vector<8xf32>
    %254 = vector.shape_cast %253 : vector<8xf32> to vector<8x1xf32>
    %255 = tpu.reciprocal %254 {approx = true} : vector<8x1xf32> -> vector<8x1xf32>
    %256 = vector.broadcast %255 : vector<8x1xf32> to vector<8x8xf32>
    %257 = arith.mulf %252, %256 : vector<8x8xf32>
    %258 = arith.truncf %257 : vector<8x8xf32> to vector<8x8xbf16>
    %cst_79 = arith.constant dense<0.000000e+00> : vector<8x8xf32>
    %259 = tpu.matmul %258, %246, %cst_79 {dimension_numbers = #tpu.dot_dimension_numbers<[1], [0], [0], [1], [0, 0, 1, 1], [], []>} : vector<8x8xbf16>, vector<8x8xbf16>, vector<8x8xf32> -> vector<8x8xf32>
    %260 = tpu.concatenate %202, %221, %240, %259 in 1 : vector<8x8xf32>, vector<8x8xf32>, vector<8x8xf32>, vector<8x8xf32> -> vector<8x32xf32>
    %261 = arith.truncf %260 : vector<8x32xf32> to vector<8x32xbf16>
    %c1_80 = arith.constant 1 : index
    %c0_81 = arith.constant 0 : index
    %c0_82 = arith.constant 0 : index
    %262 = vector.load %arg5[%c1_80, %c0_81, %c0_82] : memref<2x32x32xbf16, #tpu.memory_space<vmem>>, vector<1x32x32xbf16>
    %263 = vector.shape_cast %262 : vector<1x32x32xbf16> to vector<32x32xbf16>
    %cst_83 = arith.constant dense<0.000000e+00> : vector<8x32xf32>
    %264 = tpu.matmul %261, %263, %cst_83 {dimension_numbers = #tpu.dot_dimension_numbers<[1], [0], [0], [1], [0, 0, 1, 1], [], []>} : vector<8x32xbf16>, vector<32x32xbf16>, vector<8x32xf32> -> vector<8x32xf32>
    %265 = vector.broadcast %167 : vector<1x32xf32> to vector<8x32xf32>
    %266 = arith.addf %264, %265 : vector<8x32xf32>
    %267 = arith.addf %164, %266 : vector<8x32xf32>
    %cst_84 = arith.constant dense<0.000000e+00> : vector<8xf32>
    %268 = vector.multi_reduction <add>, %267, %cst_84 [1] : vector<8x32xf32> to vector<8xf32>
    %269 = vector.shape_cast %268 : vector<8xf32> to vector<8x1xf32>
    %cst_85 = arith.constant 3.200000e+01 : f32
    %270 = vector.broadcast %cst_85 : f32 to vector<8x1xf32>
    %271 = arith.divf %269, %270 : vector<8x1xf32>
    %272 = vector.broadcast %271 : vector<8x1xf32> to vector<8x32xf32>
    %273 = arith.subf %267, %272 : vector<8x32xf32>
    %274 = arith.mulf %273, %273 : vector<8x32xf32>
    %cst_86 = arith.constant dense<0.000000e+00> : vector<8xf32>
    %275 = vector.multi_reduction <add>, %274, %cst_86 [1] : vector<8x32xf32> to vector<8xf32>
    %276 = vector.shape_cast %275 : vector<8xf32> to vector<8x1xf32>
    %cst_87 = arith.constant 3.200000e+01 : f32
    %277 = vector.broadcast %cst_87 : f32 to vector<8x1xf32>
    %278 = arith.divf %276, %277 : vector<8x1xf32>
    %cst_88 = arith.constant 9.99999974E-6 : f32
    %279 = vector.broadcast %cst_88 : f32 to vector<8x1xf32>
    %280 = arith.addf %278, %279 : vector<8x1xf32>
    %281 = math.rsqrt %280 : vector<8x1xf32>
    %282 = vector.broadcast %281 : vector<8x1xf32> to vector<8x32xf32>
    %283 = arith.mulf %273, %282 : vector<8x32xf32>
    %284 = vector.broadcast %168 : vector<1x32xf32> to vector<8x32xf32>
    %285 = arith.mulf %283, %284 : vector<8x32xf32>
    %286 = vector.broadcast %169 : vector<1x32xf32> to vector<8x32xf32>
    %287 = arith.addf %285, %286 : vector<8x32xf32>
    %288 = arith.truncf %287 : vector<8x32xf32> to vector<8x32xbf16>
    %c1_89 = arith.constant 1 : index
    %c0_90 = arith.constant 0 : index
    %c0_91 = arith.constant 0 : index
    %289 = vector.load %arg7[%c1_89, %c0_90, %c0_91] : memref<2x32x64xbf16, #tpu.memory_space<vmem>>, vector<1x32x64xbf16>
    %290 = vector.shape_cast %289 : vector<1x32x64xbf16> to vector<32x64xbf16>
    %cst_92 = arith.constant dense<0.000000e+00> : vector<8x64xf32>
    %291 = tpu.matmul %288, %290, %cst_92 {dimension_numbers = #tpu.dot_dimension_numbers<[1], [0], [0], [1], [0, 0, 1, 1], [], []>} : vector<8x32xbf16>, vector<32x64xbf16>, vector<8x64xf32> -> vector<8x64xf32>
    %c1_93 = arith.constant 1 : index
    %c0_94 = arith.constant 0 : index
    %c0_95 = arith.constant 0 : index
    %292 = vector.load %arg8[%c1_93, %c0_94, %c0_95] : memref<2x1x64xf32, #tpu.memory_space<vmem>>, vector<1x1x64xf32>
    %293 = vector.shape_cast %292 : vector<1x1x64xf32> to vector<1x64xf32>
    %294 = vector.broadcast %293 : vector<1x64xf32> to vector<8x64xf32>
    %295 = arith.addf %291, %294 : vector<8x64xf32>
    %cst_96 = arith.constant 0.000000e+00 : f32
    %296 = vector.broadcast %cst_96 : f32 to vector<8x64xf32>
    %297 = arith.maximumf %295, %296 : vector<8x64xf32>
    %298 = arith.truncf %297 : vector<8x64xf32> to vector<8x64xbf16>
    %c1_97 = arith.constant 1 : index
    %c0_98 = arith.constant 0 : index
    %c0_99 = arith.constant 0 : index
    %299 = vector.load %arg9[%c1_97, %c0_98, %c0_99] : memref<2x64x32xbf16, #tpu.memory_space<vmem>>, vector<1x64x32xbf16>
    %300 = vector.shape_cast %299 : vector<1x64x32xbf16> to vector<64x32xbf16>
    %cst_100 = arith.constant dense<0.000000e+00> : vector<8x32xf32>
    %301 = tpu.matmul %298, %300, %cst_100 {dimension_numbers = #tpu.dot_dimension_numbers<[1], [0], [0], [1], [0, 0, 1, 1], [], []>} : vector<8x64xbf16>, vector<64x32xbf16>, vector<8x32xf32> -> vector<8x32xf32>
    %302 = vector.broadcast %170 : vector<1x32xf32> to vector<8x32xf32>
    %303 = arith.addf %301, %302 : vector<8x32xf32>
    %304 = arith.addf %287, %303 : vector<8x32xf32>
    %cst_101 = arith.constant dense<0.000000e+00> : vector<8xf32>
    %305 = vector.multi_reduction <add>, %304, %cst_101 [1] : vector<8x32xf32> to vector<8xf32>
    %306 = vector.shape_cast %305 : vector<8xf32> to vector<8x1xf32>
    %cst_102 = arith.constant 3.200000e+01 : f32
    %307 = vector.broadcast %cst_102 : f32 to vector<8x1xf32>
    %308 = arith.divf %306, %307 : vector<8x1xf32>
    %309 = vector.broadcast %308 : vector<8x1xf32> to vector<8x32xf32>
    %310 = arith.subf %304, %309 : vector<8x32xf32>
    %311 = arith.mulf %310, %310 : vector<8x32xf32>
    %cst_103 = arith.constant dense<0.000000e+00> : vector<8xf32>
    %312 = vector.multi_reduction <add>, %311, %cst_103 [1] : vector<8x32xf32> to vector<8xf32>
    %313 = vector.shape_cast %312 : vector<8xf32> to vector<8x1xf32>
    %cst_104 = arith.constant 3.200000e+01 : f32
    %314 = vector.broadcast %cst_104 : f32 to vector<8x1xf32>
    %315 = arith.divf %313, %314 : vector<8x1xf32>
    %cst_105 = arith.constant 9.99999974E-6 : f32
    %316 = vector.broadcast %cst_105 : f32 to vector<8x1xf32>
    %317 = arith.addf %315, %316 : vector<8x1xf32>
    %318 = math.rsqrt %317 : vector<8x1xf32>
    %319 = vector.broadcast %318 : vector<8x1xf32> to vector<8x32xf32>
    %320 = arith.mulf %310, %319 : vector<8x32xf32>
    %321 = vector.broadcast %171 : vector<1x32xf32> to vector<8x32xf32>
    %322 = arith.mulf %320, %321 : vector<8x32xf32>
    %323 = vector.broadcast %172 : vector<1x32xf32> to vector<8x32xf32>
    %324 = arith.addf %322, %323 : vector<8x32xf32>
    %325 = arith.truncf %324 : vector<8x32xf32> to vector<8x32xbf16>
    %c0_106 = arith.constant 0 : index
    %c0_107 = arith.constant 0 : index
    %326 = vector.load %arg10[%c0_106, %c0_107] : memref<32x128xbf16, #tpu.memory_space<vmem>>, vector<32x128xbf16>
    %cst_108 = arith.constant dense<0.000000e+00> : vector<8x128xf32>
    %327 = tpu.matmul %325, %326, %cst_108 {dimension_numbers = #tpu.dot_dimension_numbers<[1], [0], [0], [1], [0, 0, 1, 1], [], []>} : vector<8x32xbf16>, vector<32x128xbf16>, vector<8x128xf32> -> vector<8x128xf32>
    %c0_109 = arith.constant 0 : index
    %c0_110 = arith.constant 0 : index
    %328 = vector.load %arg11[%c0_109, %c0_110] : memref<1x128xf32, #tpu.memory_space<vmem>>, vector<1x128xf32>
    %329 = vector.broadcast %328 : vector<1x128xf32> to vector<8x128xf32>
    %330 = arith.addf %327, %329 : vector<8x128xf32>
    %331 = vector.shape_cast %330 : vector<8x128xf32> to vector<1x8x128xf32>
    %c0_111 = arith.constant 0 : index
    %c0_112 = arith.constant 0 : index
    %c0_113 = arith.constant 0 : index
    %332 = vector.load %arg12[%c0_111, %c0_112, %c0_113] : memref<1x8x128xf32, #tpu.memory_space<vmem>>, vector<1x8x128xf32>
    tpu.vector_store %arg12[%c0_111, %c0_112, %c0_113], %331 {strides = array<i32>} : memref<1x8x128xf32, #tpu.memory_space<vmem>>, vector<1x8x128xf32>,
    return
  }
  func.func @transform_0(%arg0: i32) -> (i32, i32, i32) {
    %c0_i32 = arith.constant 0 : i32
    %c0_i32_0 = arith.constant 0 : i32
    %c0_i32_1 = arith.constant 0 : i32
    return %arg0, %c0_i32, %c0_i32_0 : i32, i32, i32
  }
  func.func @transform_1(%arg0: i32) -> (i32, i32) {
    %c0_i32 = arith.constant 0 : i32
    %c0_i32_0 = arith.constant 0 : i32
    %c0_i32_1 = arith.constant 0 : i32
    return %c0_i32, %c0_i32_0 : i32, i32
  }
  func.func @transform_2(%arg0: i32) -> (i32, i32, i32) {
    %c0_i32 = arith.constant 0 : i32
    %c0_i32_0 = arith.constant 0 : i32
    %c0_i32_1 = arith.constant 0 : i32
    %c0_i32_2 = arith.constant 0 : i32
    return %c0_i32, %c0_i32_0, %c0_i32_1 : i32, i32, i32
  }
  func.func @transform_3(%arg0: i32) -> (i32, i32, i32) {
    %c0_i32 = arith.constant 0 : i32
    %c0_i32_0 = arith.constant 0 : i32
    %c0_i32_1 = arith.constant 0 : i32
    %c0_i32_2 = arith.constant 0 : i32
    return %c0_i32, %c0_i32_0, %c0_i32_1 : i32, i32, i32
  }
  func.func @transform_4(%arg0: i32) -> (i32, i32, i32) {
    %c0_i32 = arith.constant 0 : i32
    %c0_i32_0 = arith.constant 0 : i32
    %c0_i32_1 = arith.constant 0 : i32
    %c0_i32_2 = arith.constant 0 : i32
    return %c0_i32, %c0_i32_0, %c0_i32_1 : i32, i32, i32
  }
  func.func @transform_5(%arg0: i32) -> (i32, i32, i32) {
    %c0_i32 = arith.constant 0 : i32
    %c0_i32_0 = arith.constant 0 : i32
    %c0_i32_1 = arith.constant 0 : i32
    %c0_i32_2 = arith.constant 0 : i32
    return %c0_i32, %c0_i32_0, %c0_i32_1 : i32, i32, i32
  }
  func.func @transform_6(%arg0: i32) -> (i32, i32, i32) {
    %c0_i32 = arith.constant 0 : i32
    %c0_i32_0 = arith.constant 0 : i32
    %c0_i32_1 = arith.constant 0 : i32
    %c0_i32_2 = arith.constant 0 : i32
    return %c0_i32, %c0_i32_0, %c0_i32_1 : i32, i32, i32
  }
  func.func @transform_7(%arg0: i32) -> (i32, i32, i32) {
    %c0_i32 = arith.constant 0 : i32
    %c0_i32_0 = arith.constant 0 : i32
    %c0_i32_1 = arith.constant 0 : i32
    %c0_i32_2 = arith.constant 0 : i32
    return %c0_i32, %c0_i32_0, %c0_i32_1 : i32, i32, i32
  }
  func.func @transform_8(%arg0: i32) -> (i32, i32, i32) {
    %c0_i32 = arith.constant 0 : i32
    %c0_i32_0 = arith.constant 0 : i32
    %c0_i32_1 = arith.constant 0 : i32
    %c0_i32_2 = arith.constant 0 : i32
    return %c0_i32, %c0_i32_0, %c0_i32_1 : i32, i32, i32
  }
  func.func @transform_9(%arg0: i32) -> (i32, i32) {
    %c0_i32 = arith.constant 0 : i32
    %c0_i32_0 = arith.constant 0 : i32
    %c0_i32_1 = arith.constant 0 : i32
    return %c0_i32, %c0_i32_0 : i32, i32
  }
  func.func @transform_10(%arg0: i32) -> (i32, i32) {
    %c0_i32 = arith.constant 0 : i32
    %c0_i32_0 = arith.constant 0 : i32
    %c0_i32_1 = arith.constant 0 : i32
    return %c0_i32, %c0_i32_0 : i32, i32
  }
  func.func @transform_11(%arg0: i32) -> (i32, i32, i32) {
    %c0_i32 = arith.constant 0 : i32
    %c0_i32_0 = arith.constant 0 : i32
    %c0_i32_1 = arith.constant 0 : i32
    return %arg0, %c0_i32, %c0_i32_0 : i32, i32, i32
  }
}

</mosaic_0001>

<bundles_post_ra>
// kernel: transformer_encoder_forward.1
= control target key start
LH: loop header
LB: loop body
LE: loop exit
PB: predicated region body
PF: predicated region fallthrough
CT: control target
= control target key end

     0   :  { %16 = vsyncpa [#allocation3], 0  ;;  %s3255_s0 = inlined_call_operand.vmem [shape: f32[2,8,32], index: 0, kind: input, shape index: {}]   ;;  %s3256_s1 = inlined_call_operand.hbm [shape: f32[8,32], index: 1, kind: input, shape index: {}]   ;;  %s3257_s2 = inlined_call_operand.vmem [shape: bf16[2,32,96], index: 2, kind: input, shape index: {}]   ;;  %s3258_s3 = inlined_call_operand.vmem [shape: f32[2,1,96], index: 3, kind: input, shape index: {}]   ;;  %s3259_s4 = inlined_call_operand.vmem [shape: bf16[2,32,32], index: 4, kind: input, shape index: {}]   ;;  %s3260_s5 = inlined_call_operand.vmem [shape: f32[2,6,32], index: 5, kind: input, shape index: {}]   ;;  %s3261_s6 = inlined_call_operand.vmem [shape: bf16[2,32,64], index: 6, kind: input, shape index: {}]   ;;  %s3262_s7 = inlined_call_operand.vmem [shape: f32[2,1,64], index: 7, kind: input, shape index: {}]   ;;  %s3263_s8 = inlined_call_operand.vmem [shape: bf16[2,64,32], index: 8, kind: input, shape index: {}]   ;;  %s3264_s9 = inlined_call_operand.vmem [shape: bf16[32,128], index: 9, kind: input, shape index: {}]   ;;  %s3265_s10 = inlined_call_operand.vmem [shape: f32[1,128], index: 10, kind: input, shape index: {}]   ;;  %s3266_s11 = inlined_call_operand.hbm [shape: f32[2,8,128], index: 11, kind: output, shape index: {}]  }
   0x1   :  { %17 = vsyncpa [#allocation4], 0 }
   0x2   :  { %19 = vsyncpa [#allocation4 + $0x1], 0  ;;  %s2760_s17 = smov 0   ;;  %s2762_s18 = smov 0  }
   0x3   :  { %s2764_s19 = smov 0   ;;  %s2766_s20 = smov 0  }
   0x4 LB: > { %s2781_s21 = sadd.s32 4294967295, %s2680_s20   ;;  %s2132_s22 = sadd.s32 4294967294, %s2680_s20   ;;  %s2680_s20 = sphi %s2766_s20, %s3306_s20   ;;  %s2676_s19 = sphi %s2764_s19, %s3305_s19   ;;  %s2672_s18 = sphi %s2762_s18, %s3304_s18   ;;  %s2668_s17 = sphi %s2760_s17, %s3303_s17  }
   0x5   : > { %s2785_s23 = sadd.s32 1, %s2680_s20   ;;  %s268_s24 = sadd.s32 1, %s2676_s19 }
   0x6   : > { %s265_s25 = ssub.s32 %s2680_s20, %s2785_s23  ;;  %p278_p0 = scmp.ne.s32.totalorder %s2676_s19, %s2672_s18 }
   0x7   : > { %p266_p1 = scmp.eq.s32.totalorder %s265_s25, 0  ;;  %p279_p2 = scmp.eq.s32.totalorder %s2781_s21, 1 }
   0x8   : > { %p284_p3 = scmp.ne.s32.totalorder %s2672_s18, %s2668_s17  ;;  %p285_p4 = scmp.eq.s32.totalorder %s2132_s22, 1 }
   0x9   : > { %s2796_s26 = scalar_select %p266_p1, %s2676_s19, %s268_s24  }
   0xa   : > { %p2798_p5 = por %p279_p2, %p278_p0  ;;  %p2802_p6 = por %p285_p4, %p284_p3 }
   0xb   : > { %3281 = sst [smem:[#allocation8_spill]] %s2796_s26  ;;  %p2133_p7 = scmp.ge.s32.totalorder %s2680_s20, 1 }
   0xc   : > { %s3282_s27 = scalar_select %p2798_p5, 1, 0 }
   0xd   : > { %s3283_s28 = scalar_select %p2802_p6, 1, 0 }
   0xe   : > { %p292_p8 = scmp.lt.s32.totalorder %s2680_s20, 3  ;;  %p3267_p9 = scmp.eq.s32.totalorder %s2781_s21, 0 }
   0xf   : > { %s2682_s30 = smov [#allocation2]   ;;  %s2586_s16 = scalar_lea.hbm %s3256_s1, 128 }
  0x10   : > { %p2809_p10 = pnand %p2133_p7, %p292_p8  ;;  %s305_s12 = sshll.u32 %s2682_s30, 4  ;;  %s306_s12 = int_to_ptr.vmem [resolvable:$true] %s305_s12 }
  0x11   : > { %p2587_p13 = scmp.ne.s32.totalorder %s3256_s1, %s2586_s16  ;;  %p2593_p3 = scmp.lt.u32.totalorder %s2586_s16, %s3256_s1 }
  0x12   : > { %s3284_s29 = scalar_select %p2809_p10, 1, 0 }
  0x13   : > { %p2464_p11 = pneg %p2809_p10 }
  0x15   : > { %p2817_p12 = pnand %p3267_p9, %p2464_p11 }
  0x17   : > { %p2588_p0 = pneg %p2817_p12 }
  0x19   : > { %p2589_p1 = pnand %p2588_p0, %p2587_p13 }
  0x1b   : > { %p2590_p2 = pneg %p2589_p1 }
  0x1d   : > { %p2595_p4 = pnand %p2593_p3, %p2590_p2 }
  0x1f   : > { %2598 = shalt.err (!%p2595_p4)
}
  0x20   : > { %s2599_s26 = scalar_lea.vmem %s306_s12, 128  ;;  %p2607_p9 = scmp.lt.s32.totalorder %s306_s12, %s306_s12 }
  0x21   : > { %p2600_p7 = scmp.ne.s32.totalorder %s306_s12, %s2599_s26  ;;  %p2608_p6 = scmp.lt.s32.totalorder %s2599_s26, %s2599_s26 }
  0x23   : > { %p2602_p8 = pnand %p2600_p7, %p2588_p0  ;;  %p2609_p5 = por %p2608_p6, %p2607_p9 }
  0x25   : > { %p2603_p11 = pneg %p2602_p8 }
  0x27   : > { %p2610_p10 = pnand %p2609_p5, %p2603_p11 }
  0x29   : > { %2613 = shalt.err (!%p2610_p10)
}
  0x2a   : > { %2467 = dma.hbm_to_vmem [thread:$0]  (!%p2817_p12), %s3256_s1, 128, %s306_s12, [#allocation3]  }
  0x2b   : > { %p3286_p13 = scmp.ne.s32.totalorder %s3284_s29, 0 }
  0x2c   : > { %p3287_p1 = scmp.eq.s32.totalorder (!%p3286_p13), %s2781_s21, 0 }
  0x2d   : > { %352 = sbr.rel (%p3286_p13) target bundleno = 5370 (0x14fa), region = 64 }
  0x34   : > { %2659 = dma.done.wait (%p3287_p1), [#allocation3], 128   ;;  %p3288_p0 = pmov %p3287_p1 }
  0x35   : > { %p391_p6 = scmp.lt.s32.totalorder %s2781_s21, 1  ;;  %v2683_v0 = vmov 0.0   ;;  %vm2684_vm0 = vmmov 0   ;;  %v2524_v1 = vld [vmem:[%s3257_s2] sm:$0xff]   ;;  %v2525_v2 = vld [vmem:[%s3257_s2 + $0x8] sm:$0xff]   ;;  %v397_v4 = vld [vmem:[#allocation2] sm:$0xff] }
  0x36   : > { %2661 = vsyncadd (%p3288_p0), [#allocation3], 4294967168  ;;  %2282 = vmatprep.subr.bf16.mxu0 %v2683_v0  ;;  %2286 = vmatprep.mubr.msk.bf16.mxu0 %vm2684_vm0, %v2683_v0  ;;  %vm424_vm1 = vcmask 261120   ;;  %v2140_v7 = vld [vmem:[%s3258_s3] ss:$0 sm:$0xff]  ;;  %s3275_s12 = smov 80  }
  0x37   : > { %s392_s26 = scalar_select %p391_p6, %s2781_s21, 1  ;;  %2290 = vmatprep.subr.bf16.mxu1 %v2683_v0  ;;  %2292 = vmatprep.mubr.msk.bf16.mxu1 %vm2684_vm0, %v2683_v0  ;;  %vm472_vm2 = vcmask 64512   ;;  %vm536_vm3 = vcmask 1043456   ;;  %vm923_vm4 = vcmask 130048   ;;  %vm925_vm5 = vcmask 195584  }
  0x38   : > { %2283 = vmatpush3.bf16.msra.mxu0 %v2524_v1  ;;  %s2688_s13 = smov 88   ;;  %s2690_s22 = smov 112   ;;  %vm1121_vm6 = vcmask 523264  }
  0x39   : > { %s2139_s29 = sshll.u32 %s392_s26, 3  ;;  %2284 = vmatprep.subr.bf16.mxu0 %v2683_v0  ;;  %s3280_s26 = smov 120  }
  0x3a   : > { %s394_s16 = scalar_lea.vmem %s3255_s0, %s2139_s29  ;;  %s2686_s29 = smov 96  }
  0x3b   : > { %v396_v3 = vld [vmem:[%s394_s16] sm:$0xff]  ;;  %s3274_s16 = smov 72   ;;  %s3279_s24 = smov 104  }
  0x3c   : > { %v2861_v5 = vadd.f32 %v397_v4, %v396_v3  ;;  %2285 = vmatpush3.bf16.msra.mxu0 %v2525_v2  ;;  %s3273_s25 = smov 56   ;;  %s3272_s30 = smov 64  }
  0x3d   : > { %2296 = vmatprep.subr.bf16.mxu0 %v2683_v0  ;;  %s3271_s14 = smov 40   ;;  %s3270_s15 = smov 48  }
  0x3e   : > { %v400_v6 = vpack.c.bf16 %v2861_v5, %v2861_v5  ;;  %p3300_p9 = scmp.ne.s32.totalorder %s3282_s27, 0 }
  0x40   : > { %2287 = vmatmul.mubr.msk.bf16.vlgmr.msra.gmra.mrb[0].mxu0 %vm424_vm1, %v400_v6 }
  0x41   : > { %2298 = vmatprep.mubr.msk.bf16.mxu0 %vm2684_vm0, %v2683_v0 }
 0x113   : > { %v462_v8 = vpop.f32.mrb[0].mxu0 }
 0x114   : > { %v463_v9 = vadd.f32 %v2140_v7, %v462_v8  ;;  %v2288_v10 = vpop.f32.mrb[1].mxu0 }
 0x115   : > { %v465_v11 = vpop.f32.mrb[2].mxu0 }
 0x116   : > { %v2872_v12 = vpack.c.bf16 %v463_v9, %v463_v9  ;;  %v2289_v13 = vpop.f32.mrb[3].mxu0 }
 0x118   : > { %580 = vrot.lane.b32.xlu1 %v2872_v12, %s3280_s26  ;;  %470 = vrot.lane.b32.xlu0 %v2872_v12, %s2686_s29  ;;  %s3296_s26 = smov 48  }
 0x11c   : > { %692 = vrot.lane.b32.xlu1 %v2872_v12, %s3275_s12  ;;  %582 = vrot.lane.b32.xlu0 %v2872_v12, %s2688_s13  ;;  %s3277_s12 = smov 16  }
 0x120   : > { %802 = vrot.lane.b32.xlu1 %v2872_v12, %s3274_s16  ;;  %690 = vrot.lane.b32.xlu0 %v2872_v12, %s2690_s22  ;;  %s3291_s16 = smov 80  }
 0x124   : > { %800 = vrot.lane.b32.xlu0 %v2872_v12, %s3279_s24 }
 0x18a   : > { %v471_v14 = vpop.permute.xlu0 %470  ;;  %v581_v17 = vpop.permute.xlu1 %580 }
 0x18b   : > { %v477_v15 = vsel %vm472_vm2, %v471_v14, 0 }
 0x18c   : > { %2291 = vmatpush3.bf16.xpose.msra.mxu1 %v477_v15 }
 0x18d   : > { %2302 = vmatprep.subr.bf16.mxu1 %v2683_v0 }
 0x18e   : > { %v583_v16 = vpop.permute.xlu0 %582  ;;  %v693_v19 = vpop.permute.xlu1 %692 }
 0x18f   : > { %v588_v18 = vsel %vm472_vm2, %v583_v16, 0  ;;  %v698_v20 = vsel %vm472_vm2, %v693_v19, 0 }
 0x192   : > { %v803_v21 = vpop.permute.xlu1 %802  ;;  %v691_v22 = vpop.permute.xlu0 %690 }
 0x193   : > { %2293 = vmatmul.mubr.msk.bf16.vlgmr.msra.gmra.mrb[0].mxu1 %vm472_vm2, %v2872_v12  ;;  %v808_v23 = vsel %vm472_vm2, %v803_v21, 0 }
 0x194   : > { %2303 = vmatpush3.bf16.xpose.msra.mxu1 %v588_v18  ;;  %2304 = vmatprep.mubr.msk.bf16.mxu1 %vm2684_vm0, %v2683_v0 }
 0x195   : > { %2314 = vmatprep.subr.bf16.mxu1 %v2683_v0 }
 0x196   : > { %v801_v24 = vpop.permute.xlu0 %800 }
 0x19b   : > { %2305 = vmatmul.mubr.msk.bf16.vlgmr.msra.gmra.mrb[4].mxu1 %vm472_vm2, %v581_v17 }
 0x19c   : > { %2315 = vmatpush3.bf16.xpose.msra.mxu1 %v698_v20  ;;  %2316 = vmatprep.mubr.msk.bf16.mxu1 %vm2684_vm0, %v2683_v0 }
 0x19d   : > { %2326 = vmatprep.subr.bf16.mxu1 %v2683_v0 }
 0x1a3   : > { %2317 = vmatmul.mubr.msk.bf16.vlgmr.msra.gmra.mrb[8].mxu1 %vm472_vm2, %v691_v22 }
 0x1a4   : > { %2327 = vmatpush3.bf16.xpose.msra.mxu1 %v808_v23  ;;  %2328 = vmatprep.mubr.msk.bf16.mxu1 %vm2684_vm0, %v2683_v0 }
 0x1a5   : > { %2338 = vmatprep.subr.bf16.mxu1 %v2683_v0 }
 0x1ab   : > { %2329 = vmatmul.mubr.msk.bf16.vlgmr.msra.gmra.mrb[12].mxu1 %vm472_vm2, %v801_v24 }
 0x1ac   : > { %2342 = vmatprep.mubr.msk.bf16.mxu1 %vm2684_vm0, %v2683_v0 }
 0x266   : > { %v513_v25 = vpop.f32.mrb[0].mxu1 }
 0x267   : > { %v2294_v26 = vpop.f32.mrb[1].mxu1  ;;  %v519_v27 = vsel %vm472_vm2, %v513_v25, -inf }
 0x268   : > { %520 = vmax.xlane.f32.xlu1 %v519_v27  ;;  %v516_v28 = vpop.f32.mrb[2].mxu1 }
 0x269   : > { %v2295_v29 = vpop.f32.mrb[3].mxu1 }
 0x26e   : > { %v624_v30 = vpop.f32.mrb[4].mxu1 }
 0x26f   : > { %v2306_v31 = vpop.f32.mrb[5].mxu1  ;;  %v630_v32 = vsel %vm472_vm2, %v624_v30, -inf }
 0x270   : > { %631 = vmax.xlane.f32.xlu0 %v630_v32  ;;  %v627_v33 = vpop.f32.mrb[6].mxu1 }
 0x271   : > { %v2307_v34 = vpop.f32.mrb[7].mxu1 }
 0x276   : > { %v734_v35 = vpop.f32.mrb[8].mxu1 }
 0x277   : > { %v2318_v36 = vpop.f32.mrb[9].mxu1  ;;  %v740_v37 = vsel %vm472_vm2, %v734_v35, -inf }
 0x278   : > { %741 = vmax.xlane.f32.xlu0 %v740_v37  ;;  %v737_v38 = vpop.f32.mrb[10].mxu1  ;;  %v2527_v36 = vld [vmem:[%s3259_s4 + $0x8] sm:$0xff]  }
 0x279   : > { %v2319_v39 = vpop.f32.mrb[11].mxu1 }
 0x27e   : > { %v844_v40 = vpop.f32.mrb[12].mxu1 }
 0x27f   : > { %v2330_v41 = vpop.f32.mrb[13].mxu1  ;;  %v850_v42 = vsel %vm472_vm2, %v844_v40, -inf }
 0x280   : > { %851 = vmax.xlane.f32.xlu1 %v850_v42  ;;  %v847_v43 = vpop.f32.mrb[14].mxu1 }
 0x281   : > { %v2331_v44 = vpop.f32.mrb[15].mxu1 }
 0x2f5   : > { %v521_v45 = vpop.xlane.xlu1 %520 }
 0x2f6   : > { %v522_v46 = vsub.f32 %v513_v25, %v521_v45 }
 0x2f8   : > { %v523_v47 = vmul.f32 1.442695, %v522_v46 }
 0x2fa   : > { %2546 = vpow2.f32 %v523_v47 }
 0x2fd   : > { %v632_v48 = vpop.xlane.xlu0 %631 }
 0x2fe   : > { %v633_v49 = vsub.f32 %v624_v30, %v632_v48 }
 0x300   : > { %v634_v50 = vmul.f32 1.442695, %v633_v49 }
 0x302   : > { %2548 = vpow2.f32 %v634_v50 }
 0x304   : > { %v2547_v51 = vpop.eup %2546 }
 0x305   : > { %v742_v52 = vpop.xlane.xlu0 %741  ;;  %v525_v53 = vsel %vm472_vm2, %v2547_v51, 0.0 }
 0x306   : > { %v743_v54 = vsub.f32 %v734_v35, %v742_v52  ;;  %526 = vadd.xlane.f32.xlu0 %v525_v53  ;;  %v2526_v35 = vld [vmem:[%s3259_s4] sm:$0xff]   ;;  %v932_v52 = vlaneseq }
 0x307   : > { %2339 = vmatpush3.bf16.msra.mxu1 %v2526_v35 }
 0x308   : > { %v744_v55 = vmul.f32 1.442695, %v743_v54  ;;  %2340 = vmatprep.subr.bf16.mxu1 %v2683_v0  ;;  %v2962_v53 = vshrl.u32 %v932_v52, 7 }
 0x30a   : > { %2550 = vpow2.f32 %v744_v55  ;;  %v934_v54 = vsub.s32 0, %v2962_v53  ;;  %v2968_v55 = vld [vmem:[%s3260_s5] sm:$0x3f]  ;;  %v1186_v52 = vsub.s32 5, %v2962_v53 }
 0x30b   : > { %2341 = vmatpush3.bf16.msra.mxu1 %v2527_v36 }
 0x30c   : > { %v2549_v56 = vpop.eup %2548  ;;  %2354 = vmatprep.subr.bf16.mxu1 %v2683_v0 }
 0x30d   : > { %v636_v57 = vsel %vm472_vm2, %v2549_v56, 0.0  ;;  %v852_v60 = vpop.xlane.xlu1 %851 }
 0x30e   : > { %637 = vadd.xlane.f32.xlu1 %v636_v57  ;;  %v853_v61 = vsub.f32 %v844_v40, %v852_v60 }
 0x310   : > { %v854_v62 = vmul.f32 1.442695, %v853_v61 }
 0x312   : > { %2552 = vpow2.f32 %v854_v62 }
 0x314   : > { %v2551_v58 = vpop.eup %2550 }
 0x315   : > { %v746_v59 = vsel %vm472_vm2, %v2551_v58, 0.0 }
 0x316   : > { %747 = vadd.xlane.f32.xlu0 %v746_v59 }
 0x31c   : > { %v2553_v63 = vpop.eup %2552 }
 0x31d   : > { %v856_v1 = vsel %vm472_vm2, %v2553_v63, 0.0 }
 0x31f   : > { %642 = vrot.lane.b32.xlu1 %v2872_v12, %s3273_s25  ;;  %s3292_s25 = smov 72  }
 0x32c   : > { %531 = vrot.lane.b32.xlu0 %v2872_v12, %s3272_s30  ;;  %s3276_s30 = smov 24  }
 0x330   : > { %862 = vrot.lane.b32.xlu0 %v2872_v12, %s3271_s14  ;;  %s3290_s14 = smov 104  }
 0x343   : > { %857 = vadd.xlane.f32.xlu1 %v856_v1 }
 0x354   : > { %752 = vrot.lane.b32.xlu1 %v2872_v12, %s3270_s15  ;;  %s3278_s15 = smov 8  }
 0x393   : > { %v527_v2 = vpop.xlane.xlu0 %526 }
 0x394   : > { %2554 = vrcp.f32 %v527_v2 }
 0x39b   : > { %v638_v3 = vpop.xlane.xlu1 %637 }
 0x39c   : > { %2556 = vrcp.f32 %v638_v3 }
 0x39e   : > { %v2555_v4 = vpop.eup %2554 }
 0x39f   : > { %v529_v7 = vmul.f32 %v2555_v4, %v2547_v51  ;;  %v643_v10 = vpop.permute.xlu1 %642 }
 0x3a0   : > { %v648_v14 = vsel %vm536_vm3, %v643_v10, 0 }
 0x3a1   : > { %v530_v11 = vpack.c.bf16 %v529_v7, %v529_v7  ;;  %v2528_v7 = vld [vmem:[%s3261_s6] sm:$0xff]  }
 0x3a3   : > { %v748_v6 = vpop.xlane.xlu0 %747 }
 0x3a4   : > { %2558 = vrcp.f32 %v748_v6 }
 0x3a6   : > { %v2557_v13 = vpop.eup %2556 }
 0x3a7   : > { %v532_v8 = vpop.permute.xlu0 %531  ;;  %v640_v12 = vmul.f32 %v2557_v13, %v2549_v56  ;;  %v935_v56 = vrot.slane %v2968_v55, %v934_v54 }
 0x3a8   : > { %v538_v9 = vsel %vm536_vm3, %v532_v8, 0  ;;  %v2530_v8 = vld [vmem:[%s3263_s8] sm:$0xff]  }
 0x3a9   : > { %2297 = vmatpush3.bf16.msra.mxu0 %v538_v9  ;;  %v641_v15 = vpack.c.bf16 %v640_v12, %v640_v12  ;;  %v2531_v9 = vld [vmem:[%s3263_s8 + $0x8] sm:$0xff]   ;;  %v1013_v12 = vsub.s32 2, %v2962_v53 }
 0x3aa   : > { %2308 = vmatprep.subr.bf16.mxu0 %v2683_v0 }
 0x3ab   : > { %v863_v21 = vpop.permute.xlu0 %862 }
 0x3ac   : > { %2299 = vmatmul.mubr.msk.bf16.vlgmr.msra.gmra.mrb[4].mxu0 %vm472_vm2, %v530_v11  ;;  %v868_v23 = vsel %vm536_vm3, %v863_v21, 0 }
 0x3ad   : > { %2309 = vmatpush3.bf16.msra.mxu0 %v648_v14  ;;  %2310 = vmatprep.mubr.msk.bf16.mxu0 %vm2684_vm0, %v2683_v0  ;;  %v1008_v14 = vsub.s32 1, %v2962_v53 }
 0x3ae   : > { %2320 = vmatprep.subr.bf16.mxu0 %v2683_v0  ;;  %v2559_v16 = vpop.eup %2558 }
 0x3af   : > { %v750_v18 = vmul.f32 %v2559_v16, %v2551_v58 }
 0x3b1   : > { %v751_v22 = vpack.c.bf16 %v750_v18, %v750_v18  ;;  %v1014_v18 = vrot.slane %v2968_v55, %v1013_v12 }
 0x3b4   : > { %2311 = vmatmul.mubr.msk.bf16.vlgmr.msra.gmra.mrb[8].mxu0 %vm472_vm2, %v641_v15  ;;  %v1009_v15 = vrot.slane %v2968_v55, %v1008_v14 }
 0x3b5   : > { %2322 = vmatprep.mubr.msk.bf16.mxu0 %vm2684_vm0, %v2683_v0 }
 0x3d0   : > { %v858_v17 = vpop.xlane.xlu1 %857 }
 0x3d1   : > { %2560 = vrcp.f32 %v858_v17 }
 0x3d4   : > { %v753_v19 = vpop.permute.xlu1 %752 }
 0x3d5   : > { %v758_v20 = vsel %vm536_vm3, %v753_v19, 0 }
 0x3d6   : > { %2321 = vmatpush3.bf16.msra.mxu0 %v758_v20 }
 0x3d7   : > { %2332 = vmatprep.subr.bf16.mxu0 %v2683_v0 }
 0x3d9   : > { %2323 = vmatmul.mubr.msk.bf16.vlgmr.msra.gmra.mrb[12].mxu0 %vm472_vm2, %v751_v22  ;;  %v2532_v22 = vld [vmem:[%s3263_s8 + $0x10] sm:$0xff]  }
 0x3da   : > { %2333 = vmatpush3.bf16.msra.mxu0 %v868_v23  ;;  %2334 = vmatprep.mubr.msk.bf16.mxu0 %vm2684_vm0, %v2683_v0  ;;  %v2533_v23 = vld [vmem:[%s3263_s8 + $0x18] sm:$0xff]  }
 0x3db   : > { %v2561_v24 = vpop.eup %2560  ;;  %2346 = vmatprep.subr.bf16.mxu0 %v2683_v0 }
 0x3dc   : > { %v860_v25 = vmul.f32 %v2561_v24, %v2553_v63  ;;  %v2155_v24 = vld [vmem:[%s3262_s7] ss:$0 sm:$0xff] }
 0x3de   : > { %v861_v26 = vpack.c.bf16 %v860_v25, %v860_v25 }
 0x3e1   : > { %2335 = vmatmul.mubr.msk.bf16.vlgmr.msra.gmra.mrb[16].mxu0 %vm472_vm2, %v861_v26 }
 0x3e2   : > { %2350 = vmatprep.mubr.msk.bf16.mxu0 %vm2684_vm0, %v2683_v0  ;;  %2347 = vmatpush3.bf16.msra.mxu0 %v2528_v7 }
 0x3e3   : > { %2348 = vmatprep.subr.bf16.mxu0 %v2683_v0 }
 0x47f   : > { %v574_v27 = vpop.f32.mrb[4].mxu0 }
 0x480   : > { %v2300_v28 = vpop.f32.mrb[5].mxu0 }
 0x481   : > { %v577_v29 = vpop.f32.mrb[6].mxu0 }
 0x482   : > { %v2301_v30 = vpop.f32.mrb[7].mxu0 }
 0x487   : > { %v684_v31 = vpop.f32.mrb[8].mxu0 }
 0x488   : > { %911 = vrot.lane.b32.xlu1 %v684_v31, %s3278_s15  ;;  %v2312_v32 = vpop.f32.mrb[9].mxu0 }
 0x489   : > { %v687_v33 = vpop.f32.mrb[10].mxu0  ;;  %v1095_v32 = vsub.s32 3, %v2962_v53 }
 0x48a   : > { %v2313_v34 = vpop.f32.mrb[11].mxu0 }
 0x48b   : > { %v1096_v33 = vrot.slane %v2968_v55, %v1095_v32 }
 0x4ac   : > { %v794_v37 = vpop.f32.mrb[12].mxu0 }
 0x4ad   : > { %915 = vrot.lane.b32.xlu0 %v794_v37, %s3277_s12  ;;  %v2324_v38 = vpop.f32.mrb[13].mxu0  ;;  %s3297_s12 = smov 8  }
 0x4ae   : > { %v797_v39 = vpop.f32.mrb[14].mxu0 }
 0x4af   : > { %v2325_v40 = vpop.f32.mrb[15].mxu0 }
 0x4b4   : > { %v904_v41 = vpop.f32.mrb[16].mxu0 }
 0x4b5   : > { %919 = vrot.lane.b32.xlu1 %v904_v41, %s3276_s30  ;;  %v2336_v42 = vpop.f32.mrb[17].mxu0  ;;  %s3289_s30 = smov 120  }
 0x4b6   : > { %v907_v43 = vpop.f32.mrb[18].mxu0 }
 0x4b7   : > { %v2337_v44 = vpop.f32.mrb[19].mxu0 }
 0x4fa   : > { %v912_v45 = vpop.permute.xlu1 %911 }
 0x4fb   : > { %v922_v47 = vsel %vm472_vm2, %v574_v27, %v912_v45 }
 0x51f   : > { %v916_v46 = vpop.permute.xlu0 %915 }
 0x520   : > { %v924_v48 = vsel %vm923_vm4, %v922_v47, %v916_v46  ;;  %v2534_v46 = vld [vmem:[%s3257_s2 + $0x10] sm:$0xff]   ;;  %v2535_v47 = vld [vmem:[%s3257_s2 + $0x18] sm:$0xff]  }
 0x527   : > { %v920_v49 = vpop.permute.xlu1 %919 }
 0x528   : > { %v926_v50 = vsel %vm925_vm5, %v924_v48, %v920_v49 }
 0x529   : > { %v927_v51 = vpack.c.bf16 %v926_v50, %v926_v50 }
 0x52b   : > { %2343 = vmatmul.mubr.msk.bf16.vlgmr.msra.gmra.mrb[16].mxu1 %vm424_vm1, %v927_v51  ;;  %v1181_v51 = vsub.s32 4, %v2962_v53 }
 0x52c   : > { %2362 = vmatprep.mubr.msk.bf16.mxu1 %vm2684_vm0, %v2683_v0  ;;  %2355 = vmatpush3.bf16.msra.mxu1 %v2530_v8 }
 0x52d   : > { %2356 = vmatprep.subr.bf16.mxu1 %v2683_v0 }
 0x530   : > { %2357 = vmatpush3.bf16.msra.mxu1 %v2531_v9 }
 0x531   : > { %2358 = vmatprep.subr.bf16.mxu1 %v2683_v0 }
 0x534   : > { %2359 = vmatpush3.bf16.msra.mxu1 %v2532_v22 }
 0x535   : > { %2360 = vmatprep.subr.bf16.mxu1 %v2683_v0 }
 0x538   : > { %2361 = vmatpush3.bf16.msra.mxu1 %v2533_v23 }
 0x539   : > { %2380 = vmatprep.subr.bf16.mxu1 %v2683_v0 }
 0x5fe   : > { %v985_v57 = vpop.f32.mrb[16].mxu1 }
 0x5ff   : > { %v986_v58 = vadd.f32 %v985_v57, %v935_v56  ;;  %v2344_v59 = vpop.f32.mrb[17].mxu1  ;;  %v1182_v56 = vrot.slane %v2968_v55, %v1181_v51 }
 0x600   : > { %v988_v60 = vpop.f32.mrb[18].mxu1  ;;  %v1187_v59 = vrot.slane %v2968_v55, %v1186_v52 }
 0x601   : > { %v2345_v61 = vpop.f32.mrb[19].mxu1  ;;  %v991_v62 = vadd.f32 %v986_v58, %v2861_v5  ;;  %v2529_v5 = vld [vmem:[%s3261_s6 + $0x8] sm:$0xff]  }
 0x602   : > { %2349 = vmatpush3.bf16.msra.mxu0 %v2529_v5 }
 0x603   : > { %v992_v63 = vsel %vm424_vm1, %v991_v62, 0.0  ;;  %2366 = vmatprep.subr.bf16.mxu0 %v2683_v0 }
 0x604   : > { %993 = vadd.xlane.f32.xlu0 %v992_v63  ;;  %v2170_v63 = vld [vmem:[%s3258_s3 + $0x1] ss:$0 sm:$0xff] }
 0x691   : > { %v994_v1 = vpop.xlane.xlu0 %993 }
 0x692   : > { %v996_v2 = vmul.f32 0.03125, %v994_v1 }
 0x694   : > { %v997_v3 = vsub.f32 %v991_v62, %v996_v2 }
 0x696   : > { %v998_v4 = vmul.f32 %v997_v3, %v997_v3 }
 0x698   : > { %v999_v6 = vsel %vm424_vm1, %v998_v4, 0.0 }
 0x699   : > { %1000 = vadd.xlane.f32.xlu1 %v999_v6 }
 0x726   : > { %v1001_v10 = vpop.xlane.xlu1 %1000 }
 0x727   : > { %v1002_v11 = vmul.f32 0.03125, %v1001_v10 }
 0x729   : > { %v1003_v13 = vadd.f32 1e-05, %v1002_v11 }
 0x72b   : > { %2562 = vrsqrt.f32 %v1003_v13 }
 0x735   : > { %v2563_v16 = vpop.eup %2562 }
 0x736   : > { %v1005_v17 = vmul.f32 %v2563_v16, %v997_v3 }
 0x738   : > { %v1010_v19 = vmul.f32 %v1009_v15, %v1005_v17 }
 0x73a   : > { %v1015_v20 = vadd.f32 %v1014_v18, %v1010_v19 }
 0x73c   : > { %v1016_v21 = vpack.c.bf16 %v1015_v20, %v1015_v20 }
 0x73e   : > { %2351 = vmatmul.mubr.msk.bf16.vlgmr.msra.gmra.mrb[20].mxu0 %vm424_vm1, %v1016_v21 }
 0x73f   : > { %2370 = vmatprep.mubr.msk.bf16.mxu0 %vm2684_vm0, %v2683_v0  ;;  %2367 = vmatpush3.bf16.msra.mxu0 %v2534_v46 }
 0x740   : > { %2368 = vmatprep.subr.bf16.mxu0 %v2683_v0 }
 0x743   : > { %2369 = vmatpush3.bf16.msra.mxu0 %v2535_v47 }
 0x744   : > { %2374 = vmatprep.subr.bf16.mxu0 %v2683_v0 }
 0x811   : > { %v1077_v25 = vpop.f32.mrb[20].mxu0 }
 0x812   : > { %v1078_v26 = vadd.f32 %v2155_v24, %v1077_v25  ;;  %v2352_v27 = vpop.f32.mrb[21].mxu0 }
 0x813   : > { %v1080_v28 = vpop.f32.mrb[22].mxu0 }
 0x814   : > { %v1083_v29 = vmax.f32 %v1078_v26, 0.0  ;;  %v2353_v30 = vpop.f32.mrb[23].mxu0 }
 0x816   : > { %v1084_v31 = vpack.c.bf16 %v1083_v29, %v1083_v29 }
 0x818   : > { %2363 = vmatmul.mubr.msk.bf16.vlgmr.msra.gmra.mrb[20].mxu1 %vm1121_vm6, %v1084_v31 }
 0x819   : > { %2382 = vmatprep.mubr.msk.bf16.mxu1 %vm2684_vm0, %v2683_v0 }
 0x8eb   : > { %v1159_v34 = vpop.f32.mrb[20].mxu1 }
 0x8ec   : > { %v1160_v35 = vadd.f32 %v1159_v34, %v1096_v33  ;;  %v2364_v36 = vpop.f32.mrb[21].mxu1 }
 0x8ed   : > { %v1162_v37 = vpop.f32.mrb[22].mxu1 }
 0x8ee   : > { %v2365_v38 = vpop.f32.mrb[23].mxu1  ;;  %v1165_v39 = vadd.f32 %v1160_v35, %v1015_v20 }
 0x8f0   : > { %v1166_v40 = vsel %vm424_vm1, %v1165_v39, 0.0 }
 0x8f1   : > { %1167 = vadd.xlane.f32.xlu0 %v1166_v40 }
 0x97e   : > { %v1168_v41 = vpop.xlane.xlu0 %1167 }
 0x97f   : > { %v1169_v42 = vmul.f32 0.03125, %v1168_v41 }
 0x981   : > { %v1170_v43 = vsub.f32 %v1165_v39, %v1169_v42 }
 0x983   : > { %v1171_v44 = vmul.f32 %v1170_v43, %v1170_v43 }
 0x985   : > { %v1172_v45 = vsel %vm424_vm1, %v1171_v44, 0.0 }
 0x986   : > { %1173 = vadd.xlane.f32.xlu0 %v1172_v45 }
 0xa13   : > { %v1174_v48 = vpop.xlane.xlu0 %1173 }
 0xa14   : > { %v1175_v49 = vmul.f32 0.03125, %v1174_v48 }
 0xa16   : > { %v1176_v50 = vadd.f32 1e-05, %v1175_v49 }
 0xa18   : > { %2564 = vrsqrt.f32 %v1176_v50 }
 0xa22   : > { %v2565_v57 = vpop.eup %2564 }
 0xa23   : > { %v1178_v58 = vmul.f32 %v2565_v57, %v1170_v43 }
 0xa25   : > { %v1183_v60 = vmul.f32 %v1182_v56, %v1178_v58 }
 0xa27   : > { %v3039_v61 = vadd.f32 %v1187_v59, %v1183_v60 }
 0xa29   : > { %v1191_v62 = vpack.c.bf16 %v3039_v61, %v3039_v61 }
 0xa2b   : > { %2371 = vmatmul.mubr.msk.bf16.vlgmr.msra.gmra.mrb[24].mxu0 %vm424_vm1, %v1191_v62 }
 0xa2c   : > { %2376 = vmatprep.mubr.msk.bf16.mxu0 %vm2684_vm0, %v2683_v0 }
 0xafe   : > { %v1254_v1 = vpop.f32.mrb[24].mxu0 }
 0xaff   : > { %v1255_v2 = vadd.f32 %v2170_v63, %v1254_v1  ;;  %v2372_v3 = vpop.f32.mrb[25].mxu0 }
 0xb00   : > { %v1257_v4 = vpop.f32.mrb[26].mxu0 }
 0xb01   : > { %v3049_v55 = vpack.c.bf16 %v1255_v2, %v1255_v2  ;;  %v2373_v6 = vpop.f32.mrb[27].mxu0 }
 0xb03   : > { %1372 = vrot.lane.b32.xlu0 %v3049_v55, %s2688_s13  ;;  %1262 = vrot.lane.b32.xlu1 %v3049_v55, %s2686_s29  ;;  %s3293_s29 = smov 56   ;;  %s3294_s13 = smov 64  }
 0xb07   : > { %1480 = vrot.lane.b32.xlu0 %v3049_v55, %s2690_s22  ;;  %1370 = vrot.lane.b32.xlu1 %v3049_v55, %s3289_s30  ;;  %s3295_s22 = smov 40  }
 0xb0b   : > { %1590 = vrot.lane.b32.xlu0 %v3049_v55, %s3290_s14  ;;  %1482 = vrot.lane.b32.xlu1 %v3049_v55, %s3291_s16  ;;  %s3298_s16 = smov 16  }
 0xb0f   : > { %1592 = vrot.lane.b32.xlu1 %v3049_v55, %s3292_s25  ;;  %s3299_s25 = smov 24  }
 0xb75   : > { %v1263_v7 = vpop.permute.xlu1 %1262  ;;  %v1373_v8 = vpop.permute.xlu0 %1372 }
 0xb76   : > { %v1268_v5 = vsel %vm472_vm2, %v1263_v7, 0  ;;  %v1378_v10 = vsel %vm472_vm2, %v1373_v8, 0 }
 0xb77   : > { %2375 = vmatpush3.bf16.xpose.msra.mxu0 %v1268_v5 }
 0xb78   : > { %2386 = vmatprep.subr.bf16.mxu0 %v2683_v0 }
 0xb79   : > { %v1371_v9 = vpop.permute.xlu1 %1370  ;;  %v1481_v16 = vpop.permute.xlu0 %1480 }
 0xb7d   : > { %v1483_v11 = vpop.permute.xlu1 %1482  ;;  %v1591_v18 = vpop.permute.xlu0 %1590 }
 0xb7e   : > { %2377 = vmatmul.mubr.msk.bf16.vlgmr.msra.gmra.mrb[28].mxu0 %vm472_vm2, %v3049_v55  ;;  %v1488_v13 = vsel %vm472_vm2, %v1483_v11, 0 }
 0xb7f   : > { %2387 = vmatpush3.bf16.xpose.msra.mxu0 %v1378_v10  ;;  %2388 = vmatprep.mubr.msk.bf16.mxu0 %vm2684_vm0, %v2683_v0 }
 0xb80   : > { %2398 = vmatprep.subr.bf16.mxu0 %v2683_v0 }
 0xb81   : > { %v1593_v15 = vpop.permute.xlu1 %1592 }
 0xb82   : > { %v1598_v17 = vsel %vm472_vm2, %v1593_v15, 0 }
 0xb86   : > { %2389 = vmatmul.mubr.msk.bf16.vlgmr.msra.gmra.mrb[32].mxu0 %vm472_vm2, %v1371_v9 }
 0xb87   : > { %2399 = vmatpush3.bf16.xpose.msra.mxu0 %v1488_v13  ;;  %2400 = vmatprep.mubr.msk.bf16.mxu0 %vm2684_vm0, %v2683_v0 }
 0xb88   : > { %2410 = vmatprep.subr.bf16.mxu0 %v2683_v0 }
 0xb8e   : > { %2401 = vmatmul.mubr.msk.bf16.vlgmr.msra.gmra.mrb[36].mxu0 %vm472_vm2, %v1481_v16 }
 0xb8f   : > { %2411 = vmatpush3.bf16.xpose.msra.mxu0 %v1598_v17  ;;  %2412 = vmatprep.mubr.msk.bf16.mxu0 %vm2684_vm0, %v2683_v0 }
 0xb90   : > { %2422 = vmatprep.subr.bf16.mxu0 %v2683_v0 }
 0xb96   : > { %2413 = vmatmul.mubr.msk.bf16.vlgmr.msra.gmra.mrb[40].mxu0 %vm472_vm2, %v1591_v18 }
 0xb97   : > { %2426 = vmatprep.mubr.msk.bf16.mxu0 %vm2684_vm0, %v2683_v0 }
 0xc51   : > { %v1304_v19 = vpop.f32.mrb[28].mxu0 }
 0xc52   : > { %v2378_v20 = vpop.f32.mrb[29].mxu0  ;;  %v1310_v21 = vsel %vm472_vm2, %v1304_v19, -inf }
 0xc53   : > { %1311 = vmax.xlane.f32.xlu1 %v1310_v21  ;;  %v1307_v22 = vpop.f32.mrb[30].mxu0 }
 0xc54   : > { %v2379_v23 = vpop.f32.mrb[31].mxu0 }
 0xc59   : > { %v1414_v24 = vpop.f32.mrb[32].mxu0 }
 0xc5a   : > { %v2390_v25 = vpop.f32.mrb[33].mxu0  ;;  %v1420_v26 = vsel %vm472_vm2, %v1414_v24, -inf }
 0xc5b   : > { %1421 = vmax.xlane.f32.xlu0 %v1420_v26  ;;  %v1417_v27 = vpop.f32.mrb[34].mxu0 }
 0xc5c   : > { %v2391_v28 = vpop.f32.mrb[35].mxu0 }
 0xc61   : > { %v1524_v29 = vpop.f32.mrb[36].mxu0 }
 0xc62   : > { %v2402_v30 = vpop.f32.mrb[37].mxu0  ;;  %v1530_v31 = vsel %vm472_vm2, %v1524_v29, -inf }
 0xc63   : > { %1531 = vmax.xlane.f32.xlu0 %v1530_v31  ;;  %v1527_v33 = vpop.f32.mrb[38].mxu0 }
 0xc64   : > { %v2403_v34 = vpop.f32.mrb[39].mxu0 }
 0xc69   : > { %v1634_v35 = vpop.f32.mrb[40].mxu0 }
 0xc6a   : > { %v2414_v36 = vpop.f32.mrb[41].mxu0  ;;  %v1640_v37 = vsel %vm472_vm2, %v1634_v35, -inf }
 0xc6b   : > { %1641 = vmax.xlane.f32.xlu1 %v1640_v37  ;;  %v1637_v38 = vpop.f32.mrb[42].mxu0  ;;  %v2536_v37 = vld [vmem:[%s3259_s4 + $0x10] sm:$0xff]  }
 0xc6c   : > { %v2415_v39 = vpop.f32.mrb[43].mxu0  ;;  %2423 = vmatpush3.bf16.msra.mxu0 %v2536_v37  ;;  %v2537_v38 = vld [vmem:[%s3259_s4 + $0x18] sm:$0xff]  }
 0xc6d   : > { %2424 = vmatprep.subr.bf16.mxu0 %v2683_v0 }
 0xc70   : > { %2425 = vmatpush3.bf16.msra.mxu0 %v2537_v38 }
 0xc71   : > { %2438 = vmatprep.subr.bf16.mxu0 %v2683_v0 }
 0xce0   : > { %v1312_v40 = vpop.xlane.xlu1 %1311 }
 0xce1   : > { %v1313_v41 = vsub.f32 %v1304_v19, %v1312_v40 }
 0xce3   : > { %v1314_v42 = vmul.f32 1.442695, %v1313_v41 }
 0xce5   : > { %2566 = vpow2.f32 %v1314_v42 }
 0xce8   : > { %v1422_v43 = vpop.xlane.xlu0 %1421 }
 0xce9   : > { %v1423_v44 = vsub.f32 %v1414_v24, %v1422_v43 }
 0xceb   : > { %v1424_v45 = vmul.f32 1.442695, %v1423_v44 }
 0xced   : > { %2568 = vpow2.f32 %v1424_v45 }
 0xcef   : > { %v2567_v46 = vpop.eup %2566 }
 0xcf0   : > { %v1532_v47 = vpop.xlane.xlu0 %1531  ;;  %v1316_v48 = vsel %vm472_vm2, %v2567_v46, 0.0 }
 0xcf1   : > { %v1533_v49 = vsub.f32 %v1524_v29, %v1532_v47  ;;  %1317 = vadd.xlane.f32.xlu0 %v1316_v48 }
 0xcf3   : > { %v1534_v50 = vmul.f32 1.442695, %v1533_v49 }
 0xcf5   : > { %2570 = vpow2.f32 %v1534_v50 }
 0xcf7   : > { %v2569_v56 = vpop.eup %2568 }
 0xcf8   : > { %v1426_v57 = vsel %vm472_vm2, %v2569_v56, 0.0  ;;  %v1642_v60 = vpop.xlane.xlu1 %1641 }
 0xcf9   : > { %1427 = vadd.xlane.f32.xlu1 %v1426_v57  ;;  %v1643_v62 = vsub.f32 %v1634_v35, %v1642_v60 }
 0xcfb   : > { %v1644_v63 = vmul.f32 1.442695, %v1643_v62 }
 0xcfd   : > { %2572 = vpow2.f32 %v1644_v63 }
 0xcff   : > { %v2571_v58 = vpop.eup %2570 }
 0xd00   : > { %v1536_v59 = vsel %vm472_vm2, %v2571_v58, 0.0 }
 0xd01   : > { %1537 = vadd.xlane.f32.xlu0 %v1536_v59  ;;  %v3142_v59 = vld [vmem:[%s3260_s5 + $0x8] sm:$0x3f] }
 0xd02   : > { %v1724_v60 = vrot.slane %v3142_v59, %v934_v54  ;;  %v2538_v54 = vld [vmem:[%s3261_s6 + $0x10] sm:$0xff]  }
 0xd07   : > { %v2573_v1 = vpop.eup %2572 }
 0xd08   : > { %v1646_v2 = vsel %vm472_vm2, %v2573_v1, 0.0 }
 0xd0a   : > { %1432 = vrot.lane.b32.xlu1 %v3049_v55, %s3293_s29 }
 0xd17   : > { %1322 = vrot.lane.b32.xlu0 %v3049_v55, %s3294_s13 }
 0xd1b   : > { %1652 = vrot.lane.b32.xlu0 %v3049_v55, %s3295_s22  ;;  %s2216_s22 = sshll.u32 %s2781_s21, 7 }
 0xd1c   : > { %s3213_s30 = scalar_lea.hbm %s3266_s11, %s2216_s22 }
 0xd2e   : > { %1647 = vadd.xlane.f32.xlu1 %v1646_v2 }
 0xd3f   : > { %1542 = vrot.lane.b32.xlu1 %v3049_v55, %s3296_s26 }
 0xd7e   : > { %v1318_v3 = vpop.xlane.xlu0 %1317 }
 0xd7f   : > { %2574 = vrcp.f32 %v1318_v3 }
 0xd86   : > { %v1428_v4 = vpop.xlane.xlu1 %1427 }
 0xd87   : > { %2576 = vrcp.f32 %v1428_v4 }
 0xd89   : > { %v2575_v6 = vpop.eup %2574 }
 0xd8a   : > { %v1320_v5 = vmul.f32 %v2575_v6, %v2567_v46  ;;  %v1433_v10 = vpop.permute.xlu1 %1432 }
 0xd8b   : > { %v1438_v15 = vsel %vm536_vm3, %v1433_v10, 0 }
 0xd8c   : > { %v1321_v11 = vpack.c.bf16 %v1320_v5, %v1320_v5 }
 0xd8e   : > { %v1538_v7 = vpop.xlane.xlu0 %1537 }
 0xd8f   : > { %2578 = vrcp.f32 %v1538_v7 }
 0xd91   : > { %v2577_v13 = vpop.eup %2576 }
 0xd92   : > { %v1323_v8 = vpop.permute.xlu0 %1322  ;;  %v1430_v55 = vmul.f32 %v2577_v13, %v2569_v56  ;;  %v2541_v13 = vld [vmem:[%s3263_s8 + $0x28] sm:$0xff]  }
 0xd93   : > { %v1328_v9 = vsel %vm536_vm3, %v1323_v8, 0 }
 0xd94   : > { %2381 = vmatpush3.bf16.msra.mxu1 %v1328_v9  ;;  %v1431_v16 = vpack.c.bf16 %v1430_v55, %v1430_v55 }
 0xd95   : > { %2392 = vmatprep.subr.bf16.mxu1 %v2683_v0 }
 0xd96   : > { %v1653_v22 = vpop.permute.xlu0 %1652 }
 0xd97   : > { %2383 = vmatmul.mubr.msk.bf16.vlgmr.msra.gmra.mrb[24].mxu1 %vm472_vm2, %v1321_v11  ;;  %v1658_v24 = vsel %vm536_vm3, %v1653_v22, 0  ;;  %v2540_v11 = vld [vmem:[%s3263_s8 + $0x20] sm:$0xff]  }
 0xd98   : > { %2393 = vmatpush3.bf16.msra.mxu1 %v1438_v15  ;;  %2394 = vmatprep.mubr.msk.bf16.mxu1 %vm2684_vm0, %v2683_v0 }
 0xd99   : > { %2404 = vmatprep.subr.bf16.mxu1 %v2683_v0  ;;  %v2579_v17 = vpop.eup %2578 }
 0xd9a   : > { %v1540_v19 = vmul.f32 %v2579_v17, %v2571_v58  ;;  %v1797_v17 = vrot.slane %v3142_v59, %v1008_v14  ;;  %v2543_v14 = vld [vmem:[%s3263_s8 + $0x38] sm:$0xff]  }
 0xd9c   : > { %v1541_v23 = vpack.c.bf16 %v1540_v19, %v1540_v19 }
 0xd9f   : > { %2395 = vmatmul.mubr.msk.bf16.vlgmr.msra.gmra.mrb[28].mxu1 %vm472_vm2, %v1431_v16 }
 0xda0   : > { %2406 = vmatprep.mubr.msk.bf16.mxu1 %vm2684_vm0, %v2683_v0 }
 0xdbb   : > { %v1648_v18 = vpop.xlane.xlu1 %1647 }
 0xdbc   : > { %2580 = vrcp.f32 %v1648_v18 }
 0xdbf   : > { %v1543_v20 = vpop.permute.xlu1 %1542 }
 0xdc0   : > { %v1548_v21 = vsel %vm536_vm3, %v1543_v20, 0  ;;  %v1802_v20 = vrot.slane %v3142_v59, %v1013_v12  ;;  %v2194_v12 = vld [vmem:[%s3262_s7 + $0x1] ss:$0 sm:$0xff] }
 0xdc1   : > { %2405 = vmatpush3.bf16.msra.mxu1 %v1548_v21 }
 0xdc2   : > { %2416 = vmatprep.subr.bf16.mxu1 %v2683_v0 }
 0xdc4   : > { %2407 = vmatmul.mubr.msk.bf16.vlgmr.msra.gmra.mrb[32].mxu1 %vm472_vm2, %v1541_v23 }
 0xdc5   : > { %2417 = vmatpush3.bf16.msra.mxu1 %v1658_v24  ;;  %2418 = vmatprep.mubr.msk.bf16.mxu1 %vm2684_vm0, %v2683_v0  ;;  %v2542_v24 = vld [vmem:[%s3263_s8 + $0x30] sm:$0xff]  }
 0xdc6   : > { %v2581_v25 = vpop.eup %2580  ;;  %2430 = vmatprep.subr.bf16.mxu1 %v2683_v0 }
 0xdc7   : > { %v1650_v26 = vmul.f32 %v2581_v25, %v2573_v1 }
 0xdc9   : > { %v1651_v27 = vpack.c.bf16 %v1650_v26, %v1650_v26 }
 0xdcc   : > { %2419 = vmatmul.mubr.msk.bf16.vlgmr.msra.gmra.mrb[36].mxu1 %vm472_vm2, %v1651_v27 }
 0xdcd   : > { %2434 = vmatprep.mubr.msk.bf16.mxu1 %vm2684_vm0, %v2683_v0  ;;  %2431 = vmatpush3.bf16.msra.mxu1 %v2538_v54 }
 0xdce   : > { %2432 = vmatprep.subr.bf16.mxu1 %v2683_v0 }
 0xe6a   : > { %v1364_v28 = vpop.f32.mrb[24].mxu1 }
 0xe6b   : > { %v2384_v29 = vpop.f32.mrb[25].mxu1 }
 0xe6c   : > { %v1367_v30 = vpop.f32.mrb[26].mxu1 }
 0xe6d   : > { %v2385_v31 = vpop.f32.mrb[27].mxu1 }
 0xe72   : > { %v1474_v33 = vpop.f32.mrb[28].mxu1 }
 0xe73   : > { %1701 = vrot.lane.b32.xlu1 %v1474_v33, %s3297_s12  ;;  %v2396_v34 = vpop.f32.mrb[29].mxu1  ;;  %v1887_v33 = vrot.slane %v3142_v59, %v1095_v32  ;;  %v2544_v32 = vld [vmem:[%s3264_s9] sm:$0xff]  }
 0xe74   : > { %v1477_v35 = vpop.f32.mrb[30].mxu1 }
 0xe75   : > { %v2397_v36 = vpop.f32.mrb[31].mxu1 }
 0xe97   : > { %v1584_v39 = vpop.f32.mrb[32].mxu1 }
 0xe98   : > { %1705 = vrot.lane.b32.xlu0 %v1584_v39, %s3298_s16  ;;  %v2408_v40 = vpop.f32.mrb[33].mxu1  ;;  %s388_s16 = sand.u32 1, %s2672_s18  }
 0xe99   : > { %v1587_v41 = vpop.f32.mrb[34].mxu1  ;;  %s2048_s14 = scalar_lea.sflag [#allocation4], %s388_s16 }
 0xe9a   : > { %v2409_v42 = vpop.f32.mrb[35].mxu1 }
 0xe9f   : > { %v1694_v43 = vpop.f32.mrb[36].mxu1 }
 0xea0   : > { %1709 = vrot.lane.b32.xlu1 %v1694_v43, %s3299_s25  ;;  %v2420_v44 = vpop.f32.mrb[37].mxu1  ;;  %s2138_s25 = sshll.u32 %s388_s16, 3 }
 0xea1   : > { %v1697_v45 = vpop.f32.mrb[38].mxu1  ;;  %s390_s26 = scalar_lea.vmem [#allocation5], %s2138_s25  ;;  %s2699_s25 = smov [#allocation5]  }
 0xea2   : > { %v2421_v46 = vpop.f32.mrb[39].mxu1  ;;  %s2061_s12 = sshll.u32 %s390_s26, 4  ;;  %s2618_s29 = sshll.u32 %s2699_s25, 4  ;;  %s3215_s12 = int_to_ptr.vmem [resolvable:$true] %s2061_s12  ;;  %s2619_s29 = int_to_ptr.vmem [resolvable:$false] %s2618_s29 }
 0xea3   : > { %v2545_v46 = vld [vmem:[%s3264_s9 + $0x8] sm:$0xff]   ;;  %s2614_s21 = scalar_lea.vmem %s3215_s12, 128  ;;  %s2620_s13 = scalar_lea.vmem %s2619_s29, 256 }
 0xea4   : > { %p2615_p5 = scmp.ne.s32.totalorder %s3215_s12, %s2614_s21  ;;  %p2621_p2 = scmp.lt.s32.totalorder %s3215_s12, %s2619_s29 }
 0xea5   : > { %p2622_p3 = scmp.lt.s32.totalorder %s2620_s13, %s2614_s21 }
 0xea6   : > { %p2616_p10 = pnand %p2615_p5, %p3300_p9 }
 0xea7   : > { %p2623_p4 = por %p2622_p3, %p2621_p2 }
 0xea8   : > { %p2617_p12 = pneg %p2616_p10 }
 0xeaa   : > { %p2624_p7 = pnand %p2623_p4, %p2617_p12 }
 0xee5   : > { %v1702_v47 = vpop.permute.xlu1 %1701 }
 0xee6   : > { %v1712_v49 = vsel %vm472_vm2, %v1364_v28, %v1702_v47 }
 0xf0a   : > { %v1706_v48 = vpop.permute.xlu0 %1705 }
 0xf0b   : > { %v1713_v50 = vsel %vm923_vm4, %v1712_v49, %v1706_v48 }
 0xf12   : > { %v1710_v56 = vpop.permute.xlu1 %1709 }
 0xf13   : > { %v1714_v57 = vsel %vm925_vm5, %v1713_v50, %v1710_v56  ;;  %v1972_v50 = vrot.slane %v3142_v59, %v1181_v51 }
 0xf14   : > { %v1715_v58 = vpack.c.bf16 %v1714_v57, %v1714_v57 }
 0xf16   : > { %2427 = vmatmul.mubr.msk.bf16.vlgmr.msra.gmra.mrb[44].mxu0 %vm424_vm1, %v1715_v58 }
 0xf17   : > { %2446 = vmatprep.mubr.msk.bf16.mxu0 %vm2684_vm0, %v2683_v0  ;;  %2439 = vmatpush3.bf16.msra.mxu0 %v2540_v11 }
 0xf18   : > { %2440 = vmatprep.subr.bf16.mxu0 %v2683_v0 }
 0xf1b   : > { %2441 = vmatpush3.bf16.msra.mxu0 %v2541_v13 }
 0xf1c   : > { %2442 = vmatprep.subr.bf16.mxu0 %v2683_v0 }
 0xf1f   : > { %2443 = vmatpush3.bf16.msra.mxu0 %v2542_v24 }
 0xf20   : > { %2444 = vmatprep.subr.bf16.mxu0 %v2683_v0 }
 0xf23   : > { %2445 = vmatpush3.bf16.msra.mxu0 %v2543_v14 }
 0xfe9   : > { %v1774_v62 = vpop.f32.mrb[44].mxu0 }
 0xfea   : > { %v1775_v63 = vadd.f32 %v1774_v62, %v1724_v60  ;;  %v2428_v1 = vpop.f32.mrb[45].mxu0 }
 0xfeb   : > { %v1777_v2 = vpop.f32.mrb[46].mxu0 }
 0xfec   : > { %v2429_v3 = vpop.f32.mrb[47].mxu0  ;;  %v1780_v4 = vadd.f32 %v1775_v63, %v3039_v61  ;;  %v2539_v61 = vld [vmem:[%s3261_s6 + $0x18] sm:$0xff]   ;;  %v2211_v63 = vld [vmem:[%s3265_s10] ss:$0 sm:$0xff] }
 0xfed   : > { %2433 = vmatpush3.bf16.msra.mxu1 %v2539_v61 }
 0xfee   : > { %v1781_v6 = vsel %vm424_vm1, %v1780_v4, 0.0  ;;  %2450 = vmatprep.subr.bf16.mxu1 %v2683_v0 }
 0xfef   : > { %1782 = vadd.xlane.f32.xlu0 %v1781_v6 }
0x107c   : > { %v1783_v7 = vpop.xlane.xlu0 %1782 }
0x107d   : > { %v1784_v5 = vmul.f32 0.03125, %v1783_v7 }
0x107f   : > { %v1785_v8 = vsub.f32 %v1780_v4, %v1784_v5 }
0x1081   : > { %v1786_v9 = vmul.f32 %v1785_v8, %v1785_v8 }
0x1083   : > { %v1787_v10 = vsel %vm424_vm1, %v1786_v9, 0.0 }
0x1084   : > { %1788 = vadd.xlane.f32.xlu1 %v1787_v10 }
0x1111   : > { %v1789_v15 = vpop.xlane.xlu1 %1788 }
0x1112   : > { %v1790_v55 = vmul.f32 0.03125, %v1789_v15 }
0x1114   : > { %v1791_v16 = vadd.f32 1e-05, %v1790_v55 }
0x1116   : > { %2582 = vrsqrt.f32 %v1791_v16 }
0x1120   : > { %v2583_v18 = vpop.eup %2582 }
0x1121   : > { %v1793_v19 = vmul.f32 %v2583_v18, %v1785_v8 }
0x1123   : > { %v1798_v21 = vmul.f32 %v1797_v17, %v1793_v19 }
0x1125   : > { %v1803_v22 = vadd.f32 %v1802_v20, %v1798_v21 }
0x1127   : > { %v1804_v23 = vpack.c.bf16 %v1803_v22, %v1803_v22 }
0x1129   : > { %2435 = vmatmul.mubr.msk.bf16.vlgmr.msra.gmra.mrb[40].mxu1 %vm424_vm1, %v1804_v23 }
0x112a   : > { %2454 = vmatprep.mubr.msk.bf16.mxu1 %vm2684_vm0, %v2683_v0  ;;  %2451 = vmatpush3.bf16.msra.mxu1 %v2544_v32 }
0x112b   : > { %2452 = vmatprep.subr.bf16.mxu1 %v2683_v0  ;;  %v1977_v0 = vrot.slane %v3142_v59, %v1186_v52 }
0x112e   : > { %2453 = vmatpush3.bf16.msra.mxu1 %v2545_v46 }
0x11fc   : > { %v1867_v25 = vpop.f32.mrb[40].mxu1 }
0x11fd   : > { %v1868_v26 = vadd.f32 %v2194_v12, %v1867_v25  ;;  %v2436_v27 = vpop.f32.mrb[41].mxu1 }
0x11fe   : > { %v1870_v28 = vpop.f32.mrb[42].mxu1 }
0x11ff   : > { %v1873_v29 = vmax.f32 %v1868_v26, 0.0  ;;  %v2437_v30 = vpop.f32.mrb[43].mxu1 }
0x1201   : > { %v1874_v31 = vpack.c.bf16 %v1873_v29, %v1873_v29 }
0x1203   : > { %2447 = vmatmul.mubr.msk.bf16.vlgmr.msra.gmra.mrb[48].mxu0 %vm1121_vm6, %v1874_v31 }
0x12d6   : > { %v1949_v34 = vpop.f32.mrb[48].mxu0 }
0x12d7   : > { %v1950_v35 = vadd.f32 %v1949_v34, %v1887_v33  ;;  %v2448_v36 = vpop.f32.mrb[49].mxu0 }
0x12d8   : > { %v1952_v37 = vpop.f32.mrb[50].mxu0 }
0x12d9   : > { %v2449_v38 = vpop.f32.mrb[51].mxu0  ;;  %v1955_v39 = vadd.f32 %v1950_v35, %v1803_v22 }
0x12db   : > { %v1956_v40 = vsel %vm424_vm1, %v1955_v39, 0.0 }
0x12dc   : > { %1957 = vadd.xlane.f32.xlu0 %v1956_v40 }
0x1369   : > { %v1958_v41 = vpop.xlane.xlu0 %1957 }
0x136a   : > { %v1959_v42 = vmul.f32 0.03125, %v1958_v41 }
0x136c   : > { %v1960_v43 = vsub.f32 %v1955_v39, %v1959_v42 }
0x136e   : > { %v1961_v44 = vmul.f32 %v1960_v43, %v1960_v43 }
0x1370   : > { %v1962_v45 = vsel %vm424_vm1, %v1961_v44, 0.0 }
0x1371   : > { %1963 = vadd.xlane.f32.xlu0 %v1962_v45 }
0x13fe   : > { %v1964_v47 = vpop.xlane.xlu0 %1963 }
0x13ff   : > { %v1965_v48 = vmul.f32 0.03125, %v1964_v47 }
0x1401   : > { %v1966_v49 = vadd.f32 1e-05, %v1965_v48 }
0x1403   : > { %2584 = vrsqrt.f32 %v1966_v49 }
0x140d   : > { %v2585_v56 = vpop.eup %2584 }
0x140e   : > { %v1968_v57 = vmul.f32 %v2585_v56, %v1960_v43 }
0x1410   : > { %v1973_v58 = vmul.f32 %v1972_v50, %v1968_v57 }
0x1412   : > { %v1978_v60 = vadd.f32 %v1977_v0, %v1973_v58 }
0x1414   : > { %v1979_v62 = vpack.c.bf16 %v1978_v60, %v1978_v60 }
0x1416   : > { %2455 = vmatmul.mubr.msk.bf16.vlgmr.msra.gmra.mrb[44].mxu1 %vm424_vm1, %v1979_v62 }
0x14e9   : > { %v2040_v51 = vpop.f32.mrb[44].mxu1 }
0x14ea   : > { %v2041_v1 = vadd.f32 %v2211_v63, %v2040_v51  ;;  %v2456_v53 = vpop.f32.mrb[45].mxu1 }
0x14eb   : > { %v2043_v52 = vpop.f32.mrb[46].mxu1 }
0x14ec   : > { %2046 = vst [vmem:[%s390_s26] sm:$0xff] %v2041_v1  ;;  %v2457_v59 = vpop.f32.mrb[47].mxu1 }
0x14ed   : > { %2627 = shalt.err (!%p2624_p7)
}
0x14ee   : > { %s2628_s16 = scalar_lea.hbm %s3213_s30, 128  ;;  %s2632_s24 = scalar_lea.hbm %s3266_s11, 256 }
0x14ef   : > { %p2629_p8 = scmp.ne.s32.totalorder %s3213_s30, %s2628_s16  ;;  %p2633_p1 = scmp.lt.u32.totalorder %s3213_s30, %s3266_s11 }
0x14f0   : > { %p2634_p0 = scmp.lt.u32.totalorder %s2632_s24, %s2628_s16  ;;  %p2636_p5 = scmp.lt.u32.totalorder %s2628_s16, %s3213_s30 }
0x14f1   : > { %p2630_p11 = pnand %p2629_p8, %p3300_p9 }
0x14f2   : > { %p2635_p6 = por %p2634_p0, %p2633_p1 }
0x14f3   : > { %p2631_p13 = pneg %p2630_p11 }
0x14f4   : > { %p2637_p10 = por %p2636_p5, %p2635_p6 }
0x14f6   : > { %p2638_p12 = pnand %p2637_p10, %p2631_p13 }
0x14f8   : > { %2641 = shalt.err (!%p2638_p12)
}
0x14f9   : > { %2462 = dma.vmem_to_hbm [thread:$0]  (%p3300_p9), %s3215_s12, 128, %s3213_s30, %s2048_s14  }
0x14fa PF: > { %p2474_p2 = scmp.ge.s32.totalorder %s2680_s20, 2  ;;  %s2073_s21 = sand.u32 1, %s2668_s17  }
0x14fb   : > { %p3301_p3 = scmp.ne.s32.totalorder %s3283_s28, 0  ;;  %s2074_s29 = scalar_lea.sflag [#allocation4], %s2073_s21 }
0x14fd   : > { %p2469_p4 = pnand %p2474_p2, %p3301_p3 }
0x14ff   : > { %2663 = dma.done.wait (!%p2469_p4), %s2074_s29, 128  }
0x1500   : > { %2665 = vsyncadd (!%p2469_p4), %s2074_s29, 4294967168  ;;  %s3302_s13 = sld [smem:[#allocation8_spill]]  ;;  %p22_p7 = scmp.ge.s32.totalorder %s2785_s23, 4  }
0x1501   : > { %s3303_s17 = smov %s2672_s18  ;;  %s3304_s18 = smov %s2676_s19 }
0x1502   : > { %s3306_s20 = smov %s2785_s23  ;;  %24 = sbr.rel (!%p22_p7) target bundleno = 4 (0x4), region = 111 }
0x1506   : > { %s3305_s19 = smov %s3302_s13 }
0x1509   :  { %2079 = vsyncpa [#allocation3], 1 }
0x150a   :  { %2081 = vsyncpa [#allocation3 + $0x1], 1 }
0x150b   :  { %2082 = vsyncpa [#allocation4], 1 }
0x150c   :  { %2084 = vsyncpa [#allocation4 + $0x1], 1 }

</bundles_post_ra>
